<compile_context>
chip_gen: v7x
topology: tpu7x:2x2x1
jax: 0.10.0
libtpu: 0.0.40
codegen_flags: <defaults>
</compile_context>

<pallas_src>
from typing import Any, NamedTuple

import jax
import jax.numpy as jnp
from jax.experimental import pallas as pl
from jax.experimental.pallas import tpu as pltpu


# ----------------------------------------------------------------------------
# Small helpers
# ----------------------------------------------------------------------------
def _round_up(x: int, m: int) -> int:
    return ((x + m - 1) // m) * m


def _cdiv(a: int, b: int) -> int:
    return (a + b - 1) // b


def _sublane_pack(dtype) -> int:
    # rows packed per 32-bit sublane word: f32 -> 8, bf16 -> 16, int8/fp8 -> 32
    return 32 // jnp.dtype(dtype).itemsize


def _device_kind() -> str:
    try:
        return jax.devices()[0].device_kind.lower()
    except Exception:
        return ""


def _has_two_tensorcores() -> bool:
    # v7x has 2 TensorCores per chip; v5e/v6e have 1.
    return "v7" in _device_kind()


def _vmem_capacity_bytes() -> int:
    try:
        return int(pltpu.get_tpu_info().vmem_capacity_bytes)
    except Exception:
        pass
    return (64 if _has_two_tensorcores() else 128) * 1024 * 1024


def _pipeline_mode_supported() -> bool:
    try:
        pl.BlockSpec((8, 128), lambda i: (0, 0),
                     pipeline_mode=pl.Buffered(buffer_count=1))
        return True
    except Exception:
        return False


_PIPELINE_MODE_OK = _pipeline_mode_supported()


def _pick_batch_tile(batch: int, two_cores: bool) -> int:
    """Batch tile (multiple of 8 sublanes)."""
    if not two_cores:
        # Single TensorCore: one grid step is strictly best (saves ~0.35us/step).
        return _round_up(batch, 8) if batch <= 1024 else 512
    # v7x: even step count so both TensorCores get equal work.
    steps = 2
    while _round_up(_cdiv(batch, steps), 8) > 512:
        steps += 2
    return _round_up(_cdiv(batch, steps), 8)


# ----------------------------------------------------------------------------
# Kernel
# ----------------------------------------------------------------------------
def gen_dqn_kernel(x_ref, w1_ref, b1_ref, w2_ref, b2_ref, w3_ref, b3_ref, q_ref):
    """Fused MLP on one batch tile: (Linear -> ReLU) x 2 -> Linear Q-head.

    x_ref:  (TB, Kp)    f32 obs tile (cast to the compute dtype in-kernel)
    w1_ref: (Kp, H1p)   bf16   b1_ref: (1, H1p) f32
    w2_ref: (H1p, H2p)  bf16   b2_ref: (1, H2p) f32
    w3_ref: (H2p, A)    f32    b3_ref: (1, A)   f32   (true A, no lane padding)
    q_ref:  (TB, A)     f32
    """
    cdt = w1_ref.dtype
    x = x_ref[...].astype(cdt)  # VPU cast, hides the wrapper-side pass over obs

    h1 = jnp.dot(x, w1_ref[...], preferred_element_type=jnp.float32) + b1_ref[...]
    h1 = jnp.maximum(h1, 0.0).astype(cdt)

    h2 = jnp.dot(h1, w2_ref[...], preferred_element_type=jnp.float32) + b2_ref[...]
    h2 = jnp.maximum(h2, 0.0)  # stays f32 for the f32 Q-head matmul

    q = jnp.dot(h2, w3_ref[...], preferred_element_type=jnp.float32) + b3_ref[...]
    q_ref[...] = q.astype(q_ref.dtype)


# ----------------------------------------------------------------------------
# Parameter preparation (amortized, once per set of weights)
# ----------------------------------------------------------------------------
class GenDQNParams(NamedTuple):
    w1: jax.Array
    b1: jax.Array
    w2: jax.Array
    b2: jax.Array
    w3: jax.Array
    b3: jax.Array
    input_dim: int
    num_actions: int
    k_pad: int
    h1_pad: int
    h2_pad: int
    compute_dtype: Any


def prepare_params(params, compute_dtype=jnp.bfloat16) -> GenDQNParams:
    """Pad/cast weights once so forward() does no wrapper work on them.

    Trunk weights: lane dims padded to multiples of 128, K dims to the bf16
    sublane pack (16), cast to bf16. Q-head weight/bias keep the true action
    count and stay f32. Padded rows/cols are zero -> contribute exactly 0.
    """
    w1, b1, w2, b2, w3, b3 = params
    in_dim, h1 = w1.shape
    h2 = w2.shape[1]
    a = w3.shape[1]
    kp = _round_up(in_dim, _sublane_pack(compute_dtype))
    h1p = _round_up(h1, 128)
    h2p = _round_up(h2, 128)
    f32 = jnp.float32

    def pad2(x, rows, cols, dtype):
        out = jnp.zeros((rows, cols), dtype)
        return out.at[: x.shape[0], : x.shape[1]].set(x.astype(dtype))

    return GenDQNParams(
        w1=pad2(w1, kp, h1p, compute_dtype),
        b1=pad2(b1.reshape(1, -1), 1, h1p, f32),
        w2=pad2(w2, h1p, h2p, compute_dtype),
        b2=pad2(b2.reshape(1, -1), 1, h2p, f32),
        w3=pad2(w3, h2p, a, f32),
        b3=b3.reshape(1, -1).astype(f32),
        input_dim=in_dim,
        num_actions=a,
        k_pad=kp,
        h1_pad=h1p,
        h2_pad=h2p,
        compute_dtype=compute_dtype,
    )


# ----------------------------------------------------------------------------
# pallas_call builder + forward
# ----------------------------------------------------------------------------
def _build_call(*, batch, tb, kp, h1p, h2p, a, vmem_limit, single_buffer_weights):
    resident = lambda i: (0, 0)  # constant index_map -> DMA'd once, VMEM-resident
    if single_buffer_weights:
        def rspec(shape):
            return pl.BlockSpec(shape, resident,
                                pipeline_mode=pl.Buffered(buffer_count=1))
    else:
        def rspec(shape):
            return pl.BlockSpec(shape, resident)

    return pl.pallas_call(
        gen_dqn_kernel,
        out_shape=jax.ShapeDtypeStruct((batch, a), jnp.float32),
        grid=(_cdiv(batch, tb),),
        in_specs=[
            pl.BlockSpec((tb, kp), lambda i: (i, 0)),  # obs: streamed per batch tile
            rspec((kp, h1p)),
            rspec((1, h1p)),
            rspec((h1p, h2p)),
            rspec((1, h2p)),
            rspec((h2p, a)),
            rspec((1, a)),
        ],
        out_specs=pl.BlockSpec((tb, a), lambda i: (i, 0)),
        compiler_params=pltpu.CompilerParams(
            dimension_semantics=("parallel",),
            vmem_limit_bytes=vmem_limit,
        ),
    )


def gen_dqn_forward(obs, prepared: GenDQNParams, state=None, *, batch_tile=None):
    """Mapping: s -> Q(s, *). Returns (q_values, state) like GenDQN.forward."""
    p = prepared
    batch, in_dim = obs.shape
    assert in_dim == p.input_dim, "obs feature dim does not match prepared params"

    # No batch padding (ragged last tile is clipped by Pallas) and no obs copy
    # unless the feature dim itself is misaligned with the bf16 sublane pack.
    if p.k_pad != in_dim:
        obs = jnp.pad(obs, ((0, 0), (0, p.k_pad - in_dim)))

    if batch_tile is None:
        tb = _pick_batch_tile(batch, _has_two_tensorcores())
    else:
        tb = _round_up(int(batch_tile), 8)

    # Per-generation VMEM budget with headroom (≈54 MiB on v7x, ≈108 MiB v5e/v6e).
    vmem_limit = max(32 * 1024 * 1024, int(0.85 * _vmem_capacity_bytes()))

    args = (obs, p.w1, p.b1, p.w2, p.b2, p.w3, p.b3)
    kwargs = dict(batch=batch, tb=tb, kp=p.k_pad, h1p=p.h1_pad, h2p=p.h2_pad,
                  a=p.num_actions, vmem_limit=vmem_limit)

    if _PIPELINE_MODE_OK:
        try:
            q = _build_call(single_buffer_weights=True, **kwargs)(*args)
            return q, state
        except Exception:
            pass  # fall back to default double-buffered resident weights
    q = _build_call(single_buffer_weights=False, **kwargs)(*args)
    return q, state


# ----------------------------------------------------------------------------
# Init + references
# ----------------------------------------------------------------------------
def init_params(key, input_dim, hidden_sizes, num_actions):
    """Deterministic init; weights stored as [in, out], biases as [1, out] (f32)."""
    dims = [input_dim] + list(hidden_sizes) + [num_actions]
    params = []
    for i in range(len(dims) - 1):
        key, wk, bk = jax.random.split(key, 3)
        scale = 1.0 / jnp.sqrt(jnp.float32(dims[i]))
        w = jax.random.uniform(wk, (dims[i], dims[i + 1]), jnp.float32, -scale, scale)
        b = jax.random.uniform(bk, (1, dims[i + 1]), jnp.float32, -scale, scale)
        params += [w, b]
    return tuple(params)


def reference_forward_f32(obs, params):
    """Plain f32 JAX reference (torch semantics)."""
    w1, b1, w2, b2, w3, b3 = params
    h = jnp.maximum(obs @ w1 + b1, 0.0)
    h = jnp.maximum(h @ w2 + b2, 0.0)
    return h @ w3 + b3


def reference_forward_emulated(obs, params, compute_dtype=jnp.bfloat16):
    """Emulates kernel numerics: bf16 trunk matmuls (f32 acc), f32 Q-head."""
    w1, b1, w2, b2, w3, b3 = params
    c = compute_dtype
    h = jnp.maximum(
        jnp.dot(obs.astype(c), w1.astype(c), preferred_element_type=jnp.float32) + b1, 0.0)
    h = jnp.maximum(
        jnp.dot(h.astype(c), w2.astype(c), preferred_element_type=jnp.float32) + b2, 0.0)
    return jnp.dot(h, w3, preferred_element_type=jnp.float32) + b3


if __name__ == "__main__":
    # DQN-style shapes; batch deliberately NOT a multiple of 8 to exercise the
    # ragged-last-tile (no-batch-padding) path.
    batch, input_dim = 300, 32
    hidden_sizes = (64, 64)
    num_actions = 4  # np.prod(action_shape) with action_shape=(4,)

    key = jax.random.PRNGKey(0)
    key, obs_key = jax.random.split(key)
    obs = jax.random.normal(obs_key, (batch, input_dim), jnp.float32)
    params = init_params(key, input_dim, hidden_sizes, num_actions)

    prepared = prepare_params(params)  # pad/cast weights ONCE (amortized)

    q, state = gen_dqn_forward(obs, prepared, state=None)
    q = jax.block_until_ready(q)

    assert q.shape == (batch, num_actions)
    assert state is None

    # Tight check vs a reference that emulates the kernel's mixed-precision math.
    q_emu = reference_forward_emulated(obs, params)
    assert jnp.allclose(q, q_emu, atol=5e-3, rtol=5e-3), "mismatch vs emulated reference"

    # Loose check vs the pure-f32 module semantics (bf16 rounding tolerance).
    q_f32 = reference_forward_f32(obs, params)
    assert jnp.allclose(q, q_f32, atol=6e-2, rtol=6e-2), "mismatch vs f32 reference"

    print("KERNEL_OK")
</pallas_src>

<mosaic_0001>
module attributes {stable_mosaic.version = 11 : i64} {
  func.func @gen_dqn_kernel(%arg0: i32, %arg1: memref<304x32xf32, #tpu.memory_space<vmem>>, %arg2: memref<32x128xbf16, #tpu.memory_space<vmem>>, %arg3: memref<1x128xf32, #tpu.memory_space<vmem>>, %arg4: memref<128x128xbf16, #tpu.memory_space<vmem>>, %arg5: memref<1x128xf32, #tpu.memory_space<vmem>>, %arg6: memref<128x4xf32, #tpu.memory_space<vmem>>, %arg7: memref<1x4xf32, #tpu.memory_space<vmem>>, %arg8: memref<304x4xf32, #tpu.memory_space<vmem>>) attributes {dimension_semantics = [#tpu.dimension_semantics<parallel>], iteration_bounds = array<i64: 1>, scalar_prefetch = 0 : i64, scratch_operands = 0 : i64, tpu.core_type = #tpu.core_type<tc>, window_params = [{transform_indices = @transform_0, window_bounds = array<i64: 304, 32>}, {pipeline_mode = #tpu.pipeline_mode<synchronous>, transform_indices = @transform_1, window_bounds = array<i64: 32, 128>}, {pipeline_mode = #tpu.pipeline_mode<synchronous>, transform_indices = @transform_2, window_bounds = array<i64: 1, 128>}, {pipeline_mode = #tpu.pipeline_mode<synchronous>, transform_indices = @transform_3, window_bounds = array<i64: 128, 128>}, {pipeline_mode = #tpu.pipeline_mode<synchronous>, transform_indices = @transform_4, window_bounds = array<i64: 1, 128>}, {pipeline_mode = #tpu.pipeline_mode<synchronous>, transform_indices = @transform_5, window_bounds = array<i64: 128, 4>}, {pipeline_mode = #tpu.pipeline_mode<synchronous>, transform_indices = @transform_6, window_bounds = array<i64: 1, 4>}, {transform_indices = @transform_7, window_bounds = array<i64: 304, 4>}]} {
    %c0 = arith.constant 0 : index
    %c0_0 = arith.constant 0 : index
    %0 = vector.load %arg1[%c0, %c0_0] : memref<304x32xf32, #tpu.memory_space<vmem>>, vector<304x32xf32>
    %1 = arith.truncf %0 : vector<304x32xf32> to vector<304x32xbf16>
    %c0_1 = arith.constant 0 : index
    %c0_2 = arith.constant 0 : index
    %2 = vector.load %arg2[%c0_1, %c0_2] : memref<32x128xbf16, #tpu.memory_space<vmem>>, vector<32x128xbf16>
    %cst = arith.constant dense<0.000000e+00> : vector<304x128xf32>
    %3 = tpu.matmul %1, %2, %cst {dimension_numbers = #tpu.dot_dimension_numbers<[1], [0], [0], [1], [0, 0, 1, 1], [], []>} : vector<304x32xbf16>, vector<32x128xbf16>, vector<304x128xf32> -> vector<304x128xf32>
    %c0_3 = arith.constant 0 : index
    %c0_4 = arith.constant 0 : index
    %4 = vector.load %arg3[%c0_3, %c0_4] : memref<1x128xf32, #tpu.memory_space<vmem>>, vector<1x128xf32>
    %5 = vector.broadcast %4 : vector<1x128xf32> to vector<304x128xf32>
    %6 = arith.addf %3, %5 : vector<304x128xf32>
    %cst_5 = arith.constant 0.000000e+00 : f32
    %7 = vector.broadcast %cst_5 : f32 to vector<304x128xf32>
    %8 = arith.maximumf %6, %7 : vector<304x128xf32>
    %9 = arith.truncf %8 : vector<304x128xf32> to vector<304x128xbf16>
    %c0_6 = arith.constant 0 : index
    %c0_7 = arith.constant 0 : index
    %10 = vector.load %arg4[%c0_6, %c0_7] : memref<128x128xbf16, #tpu.memory_space<vmem>>, vector<128x128xbf16>
    %cst_8 = arith.constant dense<0.000000e+00> : vector<304x128xf32>
    %11 = tpu.matmul %9, %10, %cst_8 {dimension_numbers = #tpu.dot_dimension_numbers<[1], [0], [0], [1], [0, 0, 1, 1], [], []>} : vector<304x128xbf16>, vector<128x128xbf16>, vector<304x128xf32> -> vector<304x128xf32>
    %c0_9 = arith.constant 0 : index
    %c0_10 = arith.constant 0 : index
    %12 = vector.load %arg5[%c0_9, %c0_10] : memref<1x128xf32, #tpu.memory_space<vmem>>, vector<1x128xf32>
    %13 = vector.broadcast %12 : vector<1x128xf32> to vector<304x128xf32>
    %14 = arith.addf %11, %13 : vector<304x128xf32>
    %cst_11 = arith.constant 0.000000e+00 : f32
    %15 = vector.broadcast %cst_11 : f32 to vector<304x128xf32>
    %16 = arith.maximumf %14, %15 : vector<304x128xf32>
    %c0_12 = arith.constant 0 : index
    %c0_13 = arith.constant 0 : index
    %17 = vector.load %arg6[%c0_12, %c0_13] : memref<128x4xf32, #tpu.memory_space<vmem>>, vector<128x4xf32>
    %cst_14 = arith.constant dense<0.000000e+00> : vector<304x4xf32>
    %18 = tpu.matmul %16, %17, %cst_14 {dimension_numbers = #tpu.dot_dimension_numbers<[1], [0], [0], [1], [0, 0, 1, 1], [], []>} : vector<304x128xf32>, vector<128x4xf32>, vector<304x4xf32> -> vector<304x4xf32>
    %c0_15 = arith.constant 0 : index
    %c0_16 = arith.constant 0 : index
    %19 = vector.load %arg7[%c0_15, %c0_16] : memref<1x4xf32, #tpu.memory_space<vmem>>, vector<1x4xf32>
    %20 = vector.broadcast %19 : vector<1x4xf32> to vector<304x4xf32>
    %21 = arith.addf %18, %20 : vector<304x4xf32>
    %c0_17 = arith.constant 0 : index
    %c0_18 = arith.constant 0 : index
    %22 = vector.load %arg8[%c0_17, %c0_18] : memref<304x4xf32, #tpu.memory_space<vmem>>, vector<304x4xf32>
    tpu.vector_store %arg8[%c0_17, %c0_18], %21 {strides = array<i32>} : memref<304x4xf32, #tpu.memory_space<vmem>>, vector<304x4xf32>,
    return
  }
  func.func @transform_0(%arg0: i32) -> (i32, i32) {
    %c0_i32 = arith.constant 0 : i32
    %c0_i32_0 = arith.constant 0 : i32
    return %arg0, %c0_i32 : i32, i32
  }
  func.func @transform_1(%arg0: i32) -> (i32, i32) {
    %c0_i32 = arith.constant 0 : i32
    %c0_i32_0 = arith.constant 0 : i32
    %c0_i32_1 = arith.constant 0 : i32
    return %c0_i32, %c0_i32_0 : i32, i32
  }
  func.func @transform_2(%arg0: i32) -> (i32, i32) {
    %c0_i32 = arith.constant 0 : i32
    %c0_i32_0 = arith.constant 0 : i32
    %c0_i32_1 = arith.constant 0 : i32
    return %c0_i32, %c0_i32_0 : i32, i32
  }
  func.func @transform_3(%arg0: i32) -> (i32, i32) {
    %c0_i32 = arith.constant 0 : i32
    %c0_i32_0 = arith.constant 0 : i32
    %c0_i32_1 = arith.constant 0 : i32
    return %c0_i32, %c0_i32_0 : i32, i32
  }
  func.func @transform_4(%arg0: i32) -> (i32, i32) {
    %c0_i32 = arith.constant 0 : i32
    %c0_i32_0 = arith.constant 0 : i32
    %c0_i32_1 = arith.constant 0 : i32
    return %c0_i32, %c0_i32_0 : i32, i32
  }
  func.func @transform_5(%arg0: i32) -> (i32, i32) {
    %c0_i32 = arith.constant 0 : i32
    %c0_i32_0 = arith.constant 0 : i32
    %c0_i32_1 = arith.constant 0 : i32
    return %c0_i32, %c0_i32_0 : i32, i32
  }
  func.func @transform_6(%arg0: i32) -> (i32, i32) {
    %c0_i32 = arith.constant 0 : i32
    %c0_i32_0 = arith.constant 0 : i32
    %c0_i32_1 = arith.constant 0 : i32
    return %c0_i32, %c0_i32_0 : i32, i32
  }
  func.func @transform_7(%arg0: i32) -> (i32, i32) {
    %c0_i32 = arith.constant 0 : i32
    %c0_i32_0 = arith.constant 0 : i32
    return %arg0, %c0_i32 : i32, i32
  }
}

module attributes {stable_mosaic.version = 11 : i64} {
  func.func @gen_dqn_kernel(%arg0: i32, %arg1: memref<304x32xf32, #tpu.memory_space<vmem>>, %arg2: memref<32x128xbf16, #tpu.memory_space<vmem>>, %arg3: memref<1x128xf32, #tpu.memory_space<vmem>>, %arg4: memref<128x128xbf16, #tpu.memory_space<vmem>>, %arg5: memref<1x128xf32, #tpu.memory_space<vmem>>, %arg6: memref<128x4xf32, #tpu.memory_space<vmem>>, %arg7: memref<1x4xf32, #tpu.memory_space<vmem>>, %arg8: memref<304x4xf32, #tpu.memory_space<vmem>>) attributes {dimension_semantics = [#tpu.dimension_semantics<parallel>], iteration_bounds = array<i64: 1>, scalar_prefetch = 0 : i64, scratch_operands = 0 : i64, tpu.core_type = #tpu.core_type<tc>, window_params = [{transform_indices = @transform_0, window_bounds = array<i64: 304, 32>}, {pipeline_mode = #tpu.pipeline_mode<synchronous>, transform_indices = @transform_1, window_bounds = array<i64: 32, 128>}, {pipeline_mode = #tpu.pipeline_mode<synchronous>, transform_indices = @transform_2, window_bounds = array<i64: 1, 128>}, {pipeline_mode = #tpu.pipeline_mode<synchronous>, transform_indices = @transform_3, window_bounds = array<i64: 128, 128>}, {pipeline_mode = #tpu.pipeline_mode<synchronous>, transform_indices = @transform_4, window_bounds = array<i64: 1, 128>}, {pipeline_mode = #tpu.pipeline_mode<synchronous>, transform_indices = @transform_5, window_bounds = array<i64: 128, 4>}, {pipeline_mode = #tpu.pipeline_mode<synchronous>, transform_indices = @transform_6, window_bounds = array<i64: 1, 4>}, {transform_indices = @transform_7, window_bounds = array<i64: 304, 4>}]} {
    %c0 = arith.constant 0 : index
    %c0_0 = arith.constant 0 : index
    %0 = vector.load %arg1[%c0, %c0_0] : memref<304x32xf32, #tpu.memory_space<vmem>>, vector<304x32xf32>
    %1 = arith.truncf %0 : vector<304x32xf32> to vector<304x32xbf16>
    %c0_1 = arith.constant 0 : index
    %c0_2 = arith.constant 0 : index
    %2 = vector.load %arg2[%c0_1, %c0_2] : memref<32x128xbf16, #tpu.memory_space<vmem>>, vector<32x128xbf16>
    %cst = arith.constant dense<0.000000e+00> : vector<304x128xf32>
    %3 = tpu.matmul %1, %2, %cst {dimension_numbers = #tpu.dot_dimension_numbers<[1], [0], [0], [1], [0, 0, 1, 1], [], []>} : vector<304x32xbf16>, vector<32x128xbf16>, vector<304x128xf32> -> vector<304x128xf32>
    %c0_3 = arith.constant 0 : index
    %c0_4 = arith.constant 0 : index
    %4 = vector.load %arg3[%c0_3, %c0_4] : memref<1x128xf32, #tpu.memory_space<vmem>>, vector<1x128xf32>
    %5 = vector.broadcast %4 : vector<1x128xf32> to vector<304x128xf32>
    %6 = arith.addf %3, %5 : vector<304x128xf32>
    %cst_5 = arith.constant 0.000000e+00 : f32
    %7 = vector.broadcast %cst_5 : f32 to vector<304x128xf32>
    %8 = arith.maximumf %6, %7 : vector<304x128xf32>
    %9 = arith.truncf %8 : vector<304x128xf32> to vector<304x128xbf16>
    %c0_6 = arith.constant 0 : index
    %c0_7 = arith.constant 0 : index
    %10 = vector.load %arg4[%c0_6, %c0_7] : memref<128x128xbf16, #tpu.memory_space<vmem>>, vector<128x128xbf16>
    %cst_8 = arith.constant dense<0.000000e+00> : vector<304x128xf32>
    %11 = tpu.matmul %9, %10, %cst_8 {dimension_numbers = #tpu.dot_dimension_numbers<[1], [0], [0], [1], [0, 0, 1, 1], [], []>} : vector<304x128xbf16>, vector<128x128xbf16>, vector<304x128xf32> -> vector<304x128xf32>
    %c0_9 = arith.constant 0 : index
    %c0_10 = arith.constant 0 : index
    %12 = vector.load %arg5[%c0_9, %c0_10] : memref<1x128xf32, #tpu.memory_space<vmem>>, vector<1x128xf32>
    %13 = vector.broadcast %12 : vector<1x128xf32> to vector<304x128xf32>
    %14 = arith.addf %11, %13 : vector<304x128xf32>
    %cst_11 = arith.constant 0.000000e+00 : f32
    %15 = vector.broadcast %cst_11 : f32 to vector<304x128xf32>
    %16 = arith.maximumf %14, %15 : vector<304x128xf32>
    %c0_12 = arith.constant 0 : index
    %c0_13 = arith.constant 0 : index
    %17 = vector.load %arg6[%c0_12, %c0_13] : memref<128x4xf32, #tpu.memory_space<vmem>>, vector<128x4xf32>
    %cst_14 = arith.constant dense<0.000000e+00> : vector<304x4xf32>
    %18 = tpu.matmul %16, %17, %cst_14 {dimension_numbers = #tpu.dot_dimension_numbers<[1], [0], [0], [1], [0, 0, 1, 1], [], []>} : vector<304x128xf32>, vector<128x4xf32>, vector<304x4xf32> -> vector<304x4xf32>
    %c0_15 = arith.constant 0 : index
    %c0_16 = arith.constant 0 : index
    %19 = vector.load %arg7[%c0_15, %c0_16] : memref<1x4xf32, #tpu.memory_space<vmem>>, vector<1x4xf32>
    %20 = vector.broadcast %19 : vector<1x4xf32> to vector<304x4xf32>
    %21 = arith.addf %18, %20 : vector<304x4xf32>
    %c0_17 = arith.constant 0 : index
    %c0_18 = arith.constant 0 : index
    %22 = vector.load %arg8[%c0_17, %c0_18] : memref<304x4xf32, #tpu.memory_space<vmem>>, vector<304x4xf32>
    tpu.vector_store %arg8[%c0_17, %c0_18], %21 {strides = array<i32>} : memref<304x4xf32, #tpu.memory_space<vmem>>, vector<304x4xf32>,
    return
  }
  func.func @transform_0(%arg0: i32) -> (i32, i32) {
    %c0_i32 = arith.constant 0 : i32
    %c0_i32_0 = arith.constant 0 : i32
    return %arg0, %c0_i32 : i32, i32
  }
  func.func @transform_1(%arg0: i32) -> (i32, i32) {
    %c0_i32 = arith.constant 0 : i32
    %c0_i32_0 = arith.constant 0 : i32
    %c0_i32_1 = arith.constant 0 : i32
    return %c0_i32, %c0_i32_0 : i32, i32
  }
  func.func @transform_2(%arg0: i32) -> (i32, i32) {
    %c0_i32 = arith.constant 0 : i32
    %c0_i32_0 = arith.constant 0 : i32
    %c0_i32_1 = arith.constant 0 : i32
    return %c0_i32, %c0_i32_0 : i32, i32
  }
  func.func @transform_3(%arg0: i32) -> (i32, i32) {
    %c0_i32 = arith.constant 0 : i32
    %c0_i32_0 = arith.constant 0 : i32
    %c0_i32_1 = arith.constant 0 : i32
    return %c0_i32, %c0_i32_0 : i32, i32
  }
  func.func @transform_4(%arg0: i32) -> (i32, i32) {
    %c0_i32 = arith.constant 0 : i32
    %c0_i32_0 = arith.constant 0 : i32
    %c0_i32_1 = arith.constant 0 : i32
    return %c0_i32, %c0_i32_0 : i32, i32
  }
  func.func @transform_5(%arg0: i32) -> (i32, i32) {
    %c0_i32 = arith.constant 0 : i32
    %c0_i32_0 = arith.constant 0 : i32
    %c0_i32_1 = arith.constant 0 : i32
    return %c0_i32, %c0_i32_0 : i32, i32
  }
  func.func @transform_6(%arg0: i32) -> (i32, i32) {
    %c0_i32 = arith.constant 0 : i32
    %c0_i32_0 = arith.constant 0 : i32
    %c0_i32_1 = arith.constant 0 : i32
    return %c0_i32, %c0_i32_0 : i32, i32
  }
  func.func @transform_7(%arg0: i32) -> (i32, i32) {
    %c0_i32 = arith.constant 0 : i32
    %c0_i32_0 = arith.constant 0 : i32
    return %arg0, %c0_i32 : i32, i32
  }
}

</mosaic_0001>

<bundles_post_ra>
// kernel: tpu_custom_call.1
= control target key start
LH: loop header
LB: loop body
LE: loop exit
PB: predicated region body
PF: predicated region fallthrough
CT: control target
= control target key end

     0   :  { %12 = vsyncpa [#allocation3], 0  ;;  %s2228_s0 = inlined_call_operand.hbm [shape: f32[300,32], index: 0, kind: input, shape index: {}]   ;;  %s2229_s1 = inlined_call_operand.hbm [shape: bf16[32,128], index: 1, kind: input, shape index: {}]   ;;  %s2230_s2 = inlined_call_operand.hbm [shape: f32[1,128], index: 2, kind: input, shape index: {}]   ;;  %s2231_s3 = inlined_call_operand.hbm [shape: bf16[128,128], index: 3, kind: input, shape index: {}]   ;;  %s2232_s4 = inlined_call_operand.hbm [shape: f32[1,128], index: 4, kind: input, shape index: {}]   ;;  %s2233_s5 = inlined_call_operand.hbm [shape: f32[128,4], index: 5, kind: input, shape index: {}]   ;;  %s2234_s6 = inlined_call_operand.hbm [shape: f32[1,4], index: 6, kind: input, shape index: {}]   ;;  %s2235_s7 = inlined_call_operand.hbm [shape: f32[300,4], index: 7, kind: output, shape index: {}]  }
   0x1   :  { %13 = vsyncpa [#allocation6], 0 }
   0x2   :  { %14 = vsyncpa [#allocation9], 0 }
   0x3   :  { %15 = vsyncpa [#allocation12], 0 }
   0x4   :  { %16 = vsyncpa [#allocation4], 0  ;;  %s1785_s24 = smov [#allocation5]   ;;  %s1599_s28 = scalar_lea.hbm %s2229_s1, 256 }
   0x5   :  { %s34_s25 = sshll.u32 %s1785_s24, 4  ;;  %p1600_p0 = scmp.ne.s32.totalorder %s2229_s1, %s1599_s28  ;;  %s35_s25 = int_to_ptr.vmem [resolvable:$true] %s34_s25 }
   0x6   :  { %p1603_p1 = scmp.lt.u32.totalorder %s1599_s28, %s2229_s1 }
   0x8   :  { %p1605_p2 = pnand %p1603_p1, %p1600_p0 }
   0xa   :  { %1608 = shalt.err (!%p1605_p2)
}
   0xb   :  { %s1609_s10 = scalar_lea.vmem %s35_s25, 256  ;;  %p1614_p4 = scmp.lt.s32.totalorder %s35_s25, %s35_s25 }
   0xc   :  { %p1610_p3 = scmp.ne.s32.totalorder %s35_s25, %s1609_s10  ;;  %p1615_p5 = scmp.lt.s32.totalorder %s1609_s10, %s1609_s10 }
   0xe   :  { %p1616_p6 = por %p1615_p5, %p1614_p4 }
  0x10   :  { %p1617_p7 = pnand %p1616_p6, %p1610_p3 }
  0x12   :  { %1620 = shalt.err (!%p1617_p7)
}
  0x13   :  { %s1786_s11 = smov 64   ;;  %s1787_s12 = smov 4  }
  0x14   :  { %40 = dma.hbm_to_vmem [thread:$0]  %s2229_s1, 256, %s35_s25, [#allocation6], %s1786_s11, %s1786_s11, %s1787_s12  }
  0x15   :  { %s1788_s15 = smov [#allocation8]   ;;  %s1621_s19 = scalar_lea.hbm %s2231_s3, 1024 }
  0x16   :  { %s56_s16 = sshll.u32 %s1788_s15, 4  ;;  %p1622_p8 = scmp.ne.s32.totalorder %s2231_s3, %s1621_s19  ;;  %s57_s16 = int_to_ptr.vmem [resolvable:$true] %s56_s16 }
  0x17   :  { %p1625_p9 = scmp.lt.u32.totalorder %s1621_s19, %s2231_s3 }
  0x19   :  { %p1627_p10 = pnand %p1625_p9, %p1622_p8 }
  0x1b   :  { %1630 = shalt.err (!%p1627_p10)
}
  0x1c   :  { %s1631_s24 = scalar_lea.vmem %s57_s16, 1024  ;;  %p1636_p12 = scmp.lt.s32.totalorder %s57_s16, %s57_s16 }
  0x1d   :  { %p1632_p11 = scmp.ne.s32.totalorder %s57_s16, %s1631_s24  ;;  %p1637_p13 = scmp.lt.s32.totalorder %s1631_s24, %s1631_s24 }
  0x1f   :  { %p1638_p0 = por %p1637_p13, %p1636_p12 }
  0x21   :  { %p1639_p1 = pnand %p1638_p0, %p1632_p11 }
  0x23   :  { %1642 = shalt.err (!%p1639_p1)
}
  0x24   :  { %62 = dma.hbm_to_vmem [thread:$0]  %s2231_s3, 1024, %s57_s16, [#allocation9], %s1786_s11, %s1786_s11, %s1787_s12  }
  0x25   :  { %s1789_s26 = smov [#allocation11]   ;;  %s1790_s28 = smov [#allocation2]  }
  0x26   :  { %s78_s27 = sshll.u32 %s1789_s26, 4  ;;  %s22_s29 = sshll.u32 %s1790_s28, 4  ;;  %s79_s27 = int_to_ptr.vmem [resolvable:$true] %s78_s27  ;;  %s1863_s29 = int_to_ptr.vmem [resolvable:$true] %s22_s29 }
  0x27   :  { %s1643_s9 = scalar_lea.hbm %s2233_s5, 2048 }
  0x28   :  { %p1644_p2 = scmp.ne.s32.totalorder %s2233_s5, %s1643_s9  ;;  %p1647_p3 = scmp.lt.u32.totalorder %s1643_s9, %s2233_s5 }
  0x2a   :  { %p1649_p4 = pnand %p1647_p3, %p1644_p2 }
  0x2c   :  { %1652 = shalt.err (!%p1649_p4)
}
  0x2d   :  { %s1653_s3 = scalar_lea.vmem %s79_s27, 2048  ;;  %p1658_p6 = scmp.lt.s32.totalorder %s79_s27, %s79_s27 }
  0x2e   :  { %p1654_p5 = scmp.ne.s32.totalorder %s79_s27, %s1653_s3  ;;  %p1659_p7 = scmp.lt.s32.totalorder %s1653_s3, %s1653_s3 }
  0x30   :  { %p1660_p8 = por %p1659_p7, %p1658_p6 }
  0x32   :  { %p1661_p9 = pnand %p1660_p8, %p1654_p5 }
  0x34   :  { %1664 = shalt.err (!%p1661_p9)
}
  0x35   :  { %s1791_s11 = smov 128   ;;  %s1792_s12 = smov 8  }
  0x36   :  { %84 = dma.hbm_to_vmem [thread:$0]  %s2233_s5, 2048, %s79_s27, [#allocation12], %s1791_s11, %s1791_s11, %s1792_s12  }
  0x37   :  { %s1665_s20 = scalar_lea.hbm %s2228_s0, 4864 }
  0x38   :  { %p1666_p10 = scmp.ne.s32.totalorder %s2228_s0, %s1665_s20  ;;  %p1669_p11 = scmp.lt.u32.totalorder %s1665_s20, %s2228_s0 }
  0x3a   :  { %p1671_p12 = pnand %p1669_p11, %p1666_p10 }
  0x3c   :  { %1674 = shalt.err (!%p1671_p12)
}
  0x3d   :  { %s1675_s1 = scalar_lea.vmem %s1863_s29, 4864  ;;  %p1680_p0 = scmp.lt.s32.totalorder %s1863_s29, %s1863_s29 }
  0x3e   :  { %p1676_p13 = scmp.ne.s32.totalorder %s1863_s29, %s1675_s1  ;;  %p1681_p1 = scmp.lt.s32.totalorder %s1675_s1, %s1675_s1 }
  0x40   :  { %p1682_p2 = por %p1681_p1, %p1680_p0 }
  0x42   :  { %p1683_p3 = pnand %p1682_p2, %p1676_p13 }
  0x44   :  { %1686 = shalt.err (!%p1683_p3)
}
  0x45   :  { %28 = dma.hbm_to_vmem [thread:$0]  %s2228_s0, 4864, %s1863_s29, [#allocation3], %s1791_s11, %s1791_s11, %s1792_s12  }
  0x46   :  { %s1793_s26 = smov [#allocation7]   ;;  %s1794_s28 = smov [#allocation10]  }
  0x47   :  { %s47_s27 = sshll.u32 %s1793_s26, 4  ;;  %s69_s30 = sshll.u32 %s1794_s28, 4  ;;  %s48_s27 = int_to_ptr.vmem [resolvable:$true] %s47_s27  ;;  %s70_s30 = int_to_ptr.vmem [resolvable:$true] %s69_s30 }
  0x48   :  { %s1687_s10 = scalar_lea.hbm %s2230_s2, 16 }
  0x49   :  { %p1688_p4 = scmp.ne.s32.totalorder %s2230_s2, %s1687_s10  ;;  %p1691_p5 = scmp.lt.u32.totalorder %s1687_s10, %s2230_s2 }
  0x4b   :  { %p1693_p6 = pnand %p1691_p5, %p1688_p4 }
  0x4d   :  { %1696 = shalt.err (!%p1693_p6)
}
  0x4e   :  { %s1697_s0 = scalar_lea.vmem %s48_s27, 16  ;;  %s1701_s29 = scalar_lea.vmem %s48_s27, 32 }
  0x4f   :  { %p1698_p7 = scmp.ne.s32.totalorder %s48_s27, %s1697_s0  ;;  %p1702_p8 = scmp.lt.s32.totalorder %s48_s27, %s48_s27 }
  0x50   :  { %p1703_p9 = scmp.lt.s32.totalorder %s1701_s29, %s1697_s0 }
  0x52   :  { %p1704_p10 = por %p1703_p9, %p1702_p8 }
  0x54   :  { %p1705_p11 = pnand %p1704_p10, %p1698_p7 }
  0x56   :  { %1708 = shalt.err (!%p1705_p11)
}
  0x57   :  { %50 = dma.hbm_to_vmem [thread:$0]  %s2230_s2, 16, %s48_s27, [#allocation6]  }
  0x58   :  { %s1709_s20 = scalar_lea.hbm %s2232_s4, 16 }
  0x59   :  { %p1710_p12 = scmp.ne.s32.totalorder %s2232_s4, %s1709_s20  ;;  %p1713_p13 = scmp.lt.u32.totalorder %s1709_s20, %s2232_s4 }
  0x5b   :  { %p1715_p0 = pnand %p1713_p13, %p1710_p12 }
  0x5d   :  { %1718 = shalt.err (!%p1715_p0)
}
  0x5e   :  { %s1719_s1 = scalar_lea.vmem %s70_s30, 16  ;;  %s1723_s5 = scalar_lea.vmem %s70_s30, 32 }
  0x5f   :  { %p1720_p1 = scmp.ne.s32.totalorder %s70_s30, %s1719_s1  ;;  %p1724_p2 = scmp.lt.s32.totalorder %s70_s30, %s70_s30 }
  0x60   :  { %p1725_p3 = scmp.lt.s32.totalorder %s1723_s5, %s1719_s1 }
  0x62   :  { %p1726_p4 = por %p1725_p3, %p1724_p2 }
  0x64   :  { %p1727_p5 = pnand %p1726_p4, %p1720_p1 }
  0x66   :  { %1730 = shalt.err (!%p1727_p5)
}
  0x67   :  { %72 = dma.hbm_to_vmem [thread:$0]  %s2232_s4, 16, %s70_s30, [#allocation9]  }
  0x68   :  { %s1795_s26 = smov [#allocation13]   ;;  %s1731_s9 = scalar_lea.hbm %s2234_s6, 16 }
  0x69   :  { %s91_s27 = sshll.u32 %s1795_s26, 4  ;;  %p1732_p6 = scmp.ne.s32.totalorder %s2234_s6, %s1731_s9  ;;  %s92_s27 = int_to_ptr.vmem [resolvable:$true] %s91_s27 }
  0x6a   :  { %p1735_p7 = scmp.lt.u32.totalorder %s1731_s9, %s2234_s6 }
  0x6c   :  { %p1737_p8 = pnand %p1735_p7, %p1732_p6 }
  0x6e   :  { %1740 = shalt.err (!%p1737_p8)
}
  0x6f   :  { %s1741_s3 = scalar_lea.vmem %s92_s27, 16  ;;  %s1745_s4 = scalar_lea.vmem %s92_s27, 32 }
  0x70   :  { %p1742_p9 = scmp.ne.s32.totalorder %s92_s27, %s1741_s3  ;;  %p1746_p10 = scmp.lt.s32.totalorder %s92_s27, %s92_s27 }
  0x71   :  { %p1747_p11 = scmp.lt.s32.totalorder %s1745_s4, %s1741_s3 }
  0x73   :  { %p1748_p12 = por %p1747_p11, %p1746_p10 }
  0x75   :  { %p1749_p13 = pnand %p1748_p12, %p1742_p9 }
  0x77   :  { %1752 = shalt.err (!%p1749_p13)
}
  0x78   :  { %94 = dma.hbm_to_vmem [thread:$0]  %s2234_s6, 16, %s92_s27, [#allocation12]  }
  0x79   :  { %1775 = dma.done.wait [#allocation3], 4864  }
  0x7a   :  { %1776 = vsyncadd [#allocation3], 4294962432 }
  0x7b   :  { %1777 = dma.done.wait [#allocation6], 272  }
  0x7c   :  { %1778 = vsyncadd [#allocation6], 4294967024 }
  0x7d   :  { %1779 = dma.done.wait [#allocation9], 1040  }
  0x7e   :  { %1780 = vsyncadd [#allocation9], 4294966256 }
  0x7f   :  { %1781 = dma.done.wait [#allocation12], 2064  }
  0x80   :  { %1782 = vsyncadd [#allocation12], 4294965232  ;;  %v1796_v0 = vmov 0.0   ;;  %vm1797_vm0 = vmmov 0   ;;  %v1589_v1 = vld [vmem:[#allocation5] sm:$0xff]   ;;  %v1590_v2 = vld [vmem:[#allocation5 + $0x8] sm:$0xff]  }
  0x81   :  { %1262 = vmatprep.subr.bf16.mxu0 %v1796_v0  ;;  %1266 = vmatprep.mubr.msk.bf16.mxu0 %vm1797_vm0, %v1796_v0  ;;  %v117_v3 = vld [vmem:[#allocation2] sm:$0xff]  ;;  %v118_v4 = vld [vmem:[#allocation2 + $0x8] sm:$0xff]  ;;  %vm197_vm1 = vcmask 261120   ;;  %v119_v6 = vld [vmem:[#allocation2 + $0x10] sm:$0xff]  ;;  %vm1069_vm2 = vcmask 31744   ;;  %s1798_s6 = smov [#allocation14]  }
  0x82   :  { %1555 = vmatprep.subr.bf16.mxu1 %v1796_v0  ;;  %1326 = vmatprep.mubr.msk.bf16.mxu1 %vm1797_vm0, %v1796_v0  ;;  %v155_v5 = vpack.c.bf16 %v118_v4, %v117_v3  ;;  %v120_v7 = vld [vmem:[#allocation2 + $0x18] sm:$0xff]  ;;  %v147_v8 = vld [vmem:[#allocation2 + $0xf0] sm:$0xff]  ;;  %v149_v12 = vld [vmem:[#allocation2 + $0x100] sm:$0xff]  ;;  %s1113_s29 = sshll.u32 %s1798_s6, 4  ;;  %s1114_s29 = int_to_ptr.vmem [resolvable:$true] %s1113_s29 }
  0x83   :  { %1263 = vmatpush3.bf16.msra.mxu0 %v1589_v1  ;;  %1557 = vmatpush3.bf16.msra.mxu1 %v1589_v1  ;;  %v148_v9 = vld [vmem:[#allocation2 + $0xf8] sm:$0xff]  ;;  %v156_v10 = vpack.c.bf16 %v120_v7, %v119_v6  ;;  %v1591_v13 = vld [vmem:[#allocation8] sm:$0xff]   ;;  %v1592_v16 = vld [vmem:[#allocation8 + $0x8] sm:$0xff]   ;;  %s1753_s16 = scalar_lea.vmem %s1114_s29, 4864  ;;  %p1758_p1 = scmp.lt.s32.totalorder %s1114_s29, %s1114_s29 }
  0x84   :  { %1264 = vmatprep.subr.bf16.mxu0 %v1796_v0  ;;  %1556 = vmatprep.subr.bf16.mxu1 %v1796_v0  ;;  %v170_v11 = vpack.c.bf16 %v148_v9, %v147_v8  ;;  %v121_v14 = vld [vmem:[#allocation2 + $0x20] sm:$0xff]  ;;  %v150_v15 = vld [vmem:[#allocation2 + $0x108] sm:$0xff]  ;;  %v1593_v19 = vld [vmem:[#allocation8 + $0x10] sm:$0xff]   ;;  %p1754_p0 = scmp.ne.s32.totalorder %s1114_s29, %s1753_s16  ;;  %p1759_p2 = scmp.lt.s32.totalorder %s1753_s16, %s1753_s16 }
  0x85   :  { %v122_v17 = vld [vmem:[#allocation2 + $0x28] sm:$0xff]  ;;  %v171_v18 = vpack.c.bf16 %v150_v15, %v149_v12  ;;  %v151_v21 = vld [vmem:[#allocation2 + $0x110] sm:$0xff]  ;;  %v152_v22 = vld [vmem:[#allocation2 + $0x118] sm:$0xff] }
  0x86   :  { %v157_v20 = vpack.c.bf16 %v122_v17, %v121_v14  ;;  %v1594_v23 = vld [vmem:[#allocation8 + $0x18] sm:$0xff]   ;;  %v123_v24 = vld [vmem:[#allocation2 + $0x30] sm:$0xff]  ;;  %v172_v26 = vpack.c.bf16 %v152_v22, %v151_v21  ;;  %v1595_v28 = vld [vmem:[#allocation8 + $0x20] sm:$0xff]   ;;  %p1760_p3 = por %p1759_p2, %p1758_p1 }
  0x87   :  { %1265 = vmatpush3.bf16.msra.mxu0 %v1590_v2  ;;  %1558 = vmatpush3.bf16.msra.mxu1 %v1590_v2  ;;  %v124_v25 = vld [vmem:[#allocation2 + $0x38] sm:$0xff]  ;;  %v153_v29 = vld [vmem:[#allocation2 + $0x120] sm:$0xff]  ;;  %v154_v30 = vld [vmem:[#allocation2 + $0x128] sm:$0xff] }
  0x88   :  { %1342 = vmatprep.subr.bf16.mxu1 %v1796_v0  ;;  %v158_v27 = vpack.c.bf16 %v124_v25, %v123_v24  ;;  %v1596_v31 = vld [vmem:[#allocation8 + $0x28] sm:$0xff]   ;;  %v125_v32 = vld [vmem:[#allocation2 + $0x40] sm:$0xff]  ;;  %v173_v34 = vpack.c.bf16 %v154_v30, %v153_v29  ;;  %v128_v37 = vld [vmem:[#allocation2 + $0x58] sm:$0xff]  ;;  %p1761_p4 = pnand %p1760_p3, %p1754_p0 }
  0x89   :  { %v126_v33 = vld [vmem:[#allocation2 + $0x48] sm:$0xff]  ;;  %v127_v36 = vld [vmem:[#allocation2 + $0x50] sm:$0xff]  ;;  %v129_v39 = vld [vmem:[#allocation2 + $0x60] sm:$0xff] }
  0x8a   :  { %1267 = vmatmul.mubr.msk.bf16.vlgmr.msra.gmra.mrb[0].mxu0 %vm197_vm1, %v155_v5  ;;  %1327 = vmatmul.mubr.msk.bf16.vlgmr.msra.gmra.mrb[0].mxu1 %vm197_vm1, %v170_v11  ;;  %v159_v35 = vpack.c.bf16 %v126_v33, %v125_v32  ;;  %v160_v38 = vpack.c.bf16 %v128_v37, %v127_v36  ;;  %v130_v40 = vld [vmem:[#allocation2 + $0x68] sm:$0xff]  ;;  %v131_v42 = vld [vmem:[#allocation2 + $0x70] sm:$0xff]  ;;  %v132_v43 = vld [vmem:[#allocation2 + $0x78] sm:$0xff] }
  0x8b   :  { %1270 = vmatprep.mubr.msk.bf16.mxu0 %vm1797_vm0, %v1796_v0  ;;  %1330 = vmatprep.mubr.msk.bf16.mxu1 %vm1797_vm0, %v1796_v0  ;;  %v161_v41 = vpack.c.bf16 %v130_v40, %v129_v39  ;;  %v162_v44 = vpack.c.bf16 %v132_v43, %v131_v42  ;;  %v133_v45 = vld [vmem:[#allocation2 + $0x80] sm:$0xff]  ;;  %v134_v46 = vld [vmem:[#allocation2 + $0x88] sm:$0xff]  ;;  %v135_v48 = vld [vmem:[#allocation2 + $0x90] sm:$0xff] }
  0x8c   :  { %1343 = vmatpush3.bf16.msra.mxu1 %v1591_v13  ;;  %v163_v47 = vpack.c.bf16 %v134_v46, %v133_v45  ;;  %v136_v49 = vld [vmem:[#allocation2 + $0x98] sm:$0xff]  ;;  %v137_v51 = vld [vmem:[#allocation2 + $0xa0] sm:$0xff]  ;;  %v138_v52 = vld [vmem:[#allocation2 + $0xa8] sm:$0xff] }
  0x8d   :  { %1344 = vmatprep.subr.bf16.mxu1 %v1796_v0  ;;  %v164_v50 = vpack.c.bf16 %v136_v49, %v135_v48  ;;  %v165_v53 = vpack.c.bf16 %v138_v52, %v137_v51  ;;  %v139_v54 = vld [vmem:[#allocation2 + $0xb0] sm:$0xff]  ;;  %v140_v55 = vld [vmem:[#allocation2 + $0xb8] sm:$0xff]  ;;  %v141_v59 = vld [vmem:[#allocation2 + $0xc0] sm:$0xff] }
  0x8e   :  { %v1597_v56 = vld [vmem:[#allocation8 + $0x30] sm:$0xff]   ;;  %v166_v57 = vpack.c.bf16 %v140_v55, %v139_v54  ;;  %v1598_v58 = vld [vmem:[#allocation8 + $0x38] sm:$0xff]   ;;  %v142_v60 = vld [vmem:[#allocation2 + $0xc8] sm:$0xff] }
  0x8f   :  { %v167_v61 = vpack.c.bf16 %v142_v60, %v141_v59  ;;  %v143_v62 = vld [vmem:[#allocation2 + $0xd0] sm:$0xff]  ;;  %v144_v63 = vld [vmem:[#allocation2 + $0xd8] sm:$0xff]  ;;  %v145_v2 = vld [vmem:[#allocation2 + $0xe0] sm:$0xff] }
  0x90   :  { %1345 = vmatpush3.bf16.msra.mxu1 %v1592_v16  ;;  %v168_v1 = vpack.c.bf16 %v144_v63, %v143_v62  ;;  %v146_v3 = vld [vmem:[#allocation2 + $0xe8] sm:$0xff]  ;;  %v2007_v5 = vld [vmem:[#allocation7] ss:$0 sm:$0xff]  ;;  %v793_v63 = vld [vmem:[#allocation11 + $0x10] sm:$0xff] }
  0x91   :  { %1346 = vmatprep.subr.bf16.mxu1 %v1796_v0  ;;  %v169_v4 = vpack.c.bf16 %v146_v3, %v145_v2  ;;  %v792_v62 = vld [vmem:[#allocation11 + $0x8] sm:$0xff]  ;;  %v794_v3 = vld [vmem:[#allocation11 + $0x18] sm:$0xff] }
  0x92   :  { %1271 = vmatmul.mubr.msk.bf16.gmra.mrb[4].mxu0 %vm197_vm1, %v156_v10  ;;  %1331 = vmatmul.mubr.msk.bf16.gmra.mrb[4].mxu1 %vm197_vm1, %v171_v18 }
  0x93   :  { %1274 = vmatprep.mubr.msk.bf16.mxu0 %vm1797_vm0, %v1796_v0  ;;  %1334 = vmatprep.mubr.msk.bf16.mxu1 %vm1797_vm0, %v1796_v0 }
  0x94   :  { %1347 = vmatpush3.bf16.msra.mxu1 %v1593_v19 }
  0x95   :  { %1348 = vmatprep.subr.bf16.mxu1 %v1796_v0 }
  0x98   :  { %1349 = vmatpush3.bf16.msra.mxu1 %v1594_v23 }
  0x99   :  { %1350 = vmatprep.subr.bf16.mxu1 %v1796_v0 }
  0x9a   :  { %1275 = vmatmul.mubr.msk.bf16.gmra.mrb[8].mxu0 %vm197_vm1, %v157_v20  ;;  %1335 = vmatmul.mubr.msk.bf16.gmra.mrb[8].mxu1 %vm197_vm1, %v172_v26 }
  0x9b   :  { %1278 = vmatprep.mubr.msk.bf16.mxu0 %vm1797_vm0, %v1796_v0  ;;  %1338 = vmatprep.mubr.msk.bf16.mxu1 %vm1797_vm0, %v1796_v0 }
  0x9c   :  { %1351 = vmatpush3.bf16.msra.mxu1 %v1595_v28 }
  0x9d   :  { %1352 = vmatprep.subr.bf16.mxu1 %v1796_v0 }
  0xa0   :  { %1353 = vmatpush3.bf16.msra.mxu1 %v1596_v31 }
  0xa1   :  { %1354 = vmatprep.subr.bf16.mxu1 %v1796_v0 }
  0xa2   :  { %1279 = vmatmul.mubr.msk.bf16.gmra.mrb[12].mxu0 %vm197_vm1, %v158_v27  ;;  %1339 = vmatmul.mubr.msk.bf16.gmra.mrb[12].mxu1 %vm197_vm1, %v173_v34 }
  0xa3   :  { %1282 = vmatprep.mubr.msk.bf16.mxu0 %vm1797_vm0, %v1796_v0  ;;  %1358 = vmatprep.mubr.msk.bf16.mxu1 %vm1797_vm0, %v1796_v0 }
  0xa4   :  { %1355 = vmatpush3.bf16.msra.mxu1 %v1597_v56 }
  0xa5   :  { %1356 = vmatprep.subr.bf16.mxu1 %v1796_v0 }
  0xa8   :  { %1357 = vmatpush3.bf16.msra.mxu1 %v1598_v58 }
  0xaa   :  { %1283 = vmatmul.mubr.msk.bf16.gmra.mrb[16].mxu0 %vm197_vm1, %v159_v35 }
  0xab   :  { %1286 = vmatprep.mubr.msk.bf16.mxu0 %vm1797_vm0, %v1796_v0 }
  0xb2   :  { %1287 = vmatmul.mubr.msk.bf16.gmra.mrb[20].mxu0 %vm197_vm1, %v160_v38 }
  0xb3   :  { %1290 = vmatprep.mubr.msk.bf16.mxu0 %vm1797_vm0, %v1796_v0 }
  0xba   :  { %1291 = vmatmul.mubr.msk.bf16.gmra.mrb[24].mxu0 %vm197_vm1, %v161_v41 }
  0xbb   :  { %1294 = vmatprep.mubr.msk.bf16.mxu0 %vm1797_vm0, %v1796_v0 }
  0xc2   :  { %1295 = vmatmul.mubr.msk.bf16.gmra.mrb[28].mxu0 %vm197_vm1, %v162_v44 }
  0xc3   :  { %1298 = vmatprep.mubr.msk.bf16.mxu0 %vm1797_vm0, %v1796_v0 }
  0xca   :  { %1299 = vmatmul.mubr.msk.bf16.gmra.mrb[32].mxu0 %vm197_vm1, %v163_v47 }
  0xcb   :  { %1302 = vmatprep.mubr.msk.bf16.mxu0 %vm1797_vm0, %v1796_v0 }
  0xd2   :  { %1303 = vmatmul.mubr.msk.bf16.gmra.mrb[36].mxu0 %vm197_vm1, %v164_v50 }
  0xd3   :  { %1306 = vmatprep.mubr.msk.bf16.mxu0 %vm1797_vm0, %v1796_v0 }
  0xda   :  { %1307 = vmatmul.mubr.msk.bf16.gmra.mrb[40].mxu0 %vm197_vm1, %v165_v53 }
  0xdb   :  { %1310 = vmatprep.mubr.msk.bf16.mxu0 %vm1797_vm0, %v1796_v0 }
  0xe2   :  { %1311 = vmatmul.mubr.msk.bf16.gmra.mrb[44].mxu0 %vm197_vm1, %v166_v57 }
  0xe3   :  { %1314 = vmatprep.mubr.msk.bf16.mxu0 %vm1797_vm0, %v1796_v0 }
  0xea   :  { %1315 = vmatmul.mubr.msk.bf16.gmra.mrb[48].mxu0 %vm197_vm1, %v167_v61  ;;  %v791_v61 = vld [vmem:[#allocation11] sm:$0xff] }
  0xeb   :  { %1318 = vmatprep.mubr.msk.bf16.mxu0 %vm1797_vm0, %v1796_v0  ;;  %v1523_v2 = vpack.c.bf16 %v792_v62, %v791_v61 }
  0xed   :  { %1524 = vmatprep.subr.bf16.mxu0 %v1523_v2  ;;  %1559 = vmatprep.subr.bf16.mxu1 %v1523_v2 }
  0xee   :  { %1526 = vmatpush3.bf16.msra.mxu0 %v1523_v2 }
  0xf2   :  { %1319 = vmatmul.mubr.msk.bf16.gmra.mrb[52].mxu0 %vm197_vm1, %v168_v1 }
  0xf3   :  { %1322 = vmatprep.mubr.msk.bf16.mxu0 %vm1797_vm0, %v1796_v0 }
  0xfa   :  { %1323 = vmatmul.mubr.msk.bf16.gmra.mrb[56].mxu0 %vm197_vm1, %v169_v4 }
 0x15d   :  { %v289_v6 = vpop.f32.mrb[0].mxu0  ;;  %v409_v14 = vpop.f32.mrb[0].mxu1 }
 0x15e   :  { %v290_v7 = vadd.f32 %v2007_v5, %v289_v6  ;;  %v1268_v8 = vpop.f32.mrb[1].mxu0  ;;  %v410_v16 = vadd.f32 %v2007_v5, %v409_v14  ;;  %v1328_v17 = vpop.f32.mrb[1].mxu1 }
 0x15f   :  { %v292_v9 = vpop.f32.mrb[2].mxu0  ;;  %v412_v19 = vpop.f32.mrb[2].mxu1  ;;  %v1527_v8 = vpack.c.bf16 %v794_v3, %v793_v63 }
 0x160   :  { %v293_v10 = vadd.f32 %v2007_v5, %v292_v9  ;;  %v1269_v11 = vpop.f32.mrb[3].mxu0  ;;  %v440_v12 = vmax.f32 %v290_v7, 0.0  ;;  %v470_v22 = vmax.f32 %v410_v16, 0.0  ;;  %v413_v23 = vadd.f32 %v2007_v5, %v412_v19  ;;  %v1329_v24 = vpop.f32.mrb[3].mxu1  ;;  %v795_v9 = vld [vmem:[#allocation11 + $0x20] sm:$0xff]  ;;  %v797_v19 = vld [vmem:[#allocation11 + $0x30] sm:$0xff] }
 0x161   :  { %1528 = vmatprep.subr.bf16.mxu0 %v1527_v8 }
 0x162   :  { %v441_v13 = vmax.f32 %v293_v10, 0.0  ;;  %v471_v28 = vmax.f32 %v413_v23, 0.0  ;;  %v796_v10 = vld [vmem:[#allocation11 + $0x28] sm:$0xff]  ;;  %1530 = vmatpush3.bf16.msra.mxu0 %v1527_v8 }
 0x164   :  { %v478_v15 = vpack.c.bf16 %v441_v13, %v440_v12  ;;  %v2017_v31 = vpack.c.bf16 %v471_v28, %v470_v22 }
 0x165   :  { %v297_v18 = vpop.f32.mrb[4].mxu0  ;;  %v417_v32 = vpop.f32.mrb[4].mxu1 }
 0x166   :  { %v298_v20 = vadd.f32 %v2007_v5, %v297_v18  ;;  %v1272_v21 = vpop.f32.mrb[5].mxu0  ;;  %1359 = vmatmul.mubr.bf16.vlgmr.msra.gmra.mrb[16].mxu1 %v478_v15  ;;  %v418_v34 = vadd.f32 %v2007_v5, %v417_v32  ;;  %v1332_v35 = vpop.f32.mrb[5].mxu1  ;;  %v1531_v15 = vpack.c.bf16 %v796_v10, %v795_v9 }
 0x167   :  { %v300_v25 = vpop.f32.mrb[6].mxu0  ;;  %1362 = vmatprep.mubr.msk.bf16.mxu1 %vm1797_vm0, %v1796_v0  ;;  %v420_v37 = vpop.f32.mrb[6].mxu1  ;;  %1567 = vmatpush3.bf16.msra.mxu1 %v1523_v2  ;;  %v800_v35 = vld [vmem:[#allocation11 + $0x48] sm:$0xff] }
 0x168   :  { %v301_v26 = vadd.f32 %v2007_v5, %v300_v25  ;;  %v1273_v27 = vpop.f32.mrb[7].mxu0  ;;  %v442_v29 = vmax.f32 %v298_v20, 0.0  ;;  %v472_v40 = vmax.f32 %v418_v34, 0.0  ;;  %v421_v41 = vadd.f32 %v2007_v5, %v420_v37  ;;  %v1333_v42 = vpop.f32.mrb[7].mxu1  ;;  %1560 = vmatprep.subr.bf16.mxu1 %v1527_v8  ;;  %v798_v20 = vld [vmem:[#allocation11 + $0x38] sm:$0xff]  ;;  %1532 = vmatprep.subr.bf16.mxu0 %v1531_v15  ;;  %v799_v34 = vld [vmem:[#allocation11 + $0x40] sm:$0xff] }
 0x169   :  { %1534 = vmatpush3.bf16.msra.mxu0 %v1531_v15  ;;  %v802_v42 = vld [vmem:[#allocation11 + $0x58] sm:$0xff] }
 0x16a   :  { %v443_v30 = vmax.f32 %v301_v26, 0.0  ;;  %v473_v46 = vmax.f32 %v421_v41, 0.0  ;;  %v801_v41 = vld [vmem:[#allocation11 + $0x50] sm:$0xff] }
 0x16b   :  { %1568 = vmatpush3.bf16.msra.mxu1 %v1527_v8 }
 0x16c   :  { %v479_v33 = vpack.c.bf16 %v443_v30, %v442_v29  ;;  %v2025_v49 = vpack.c.bf16 %v473_v46, %v472_v40  ;;  %v1535_v29 = vpack.c.bf16 %v798_v20, %v797_v19  ;;  %1561 = vmatprep.subr.bf16.mxu1 %v1531_v15 }
 0x16d   :  { %v305_v36 = vpop.f32.mrb[8].mxu0  ;;  %v425_v50 = vpop.f32.mrb[8].mxu1 }
 0x16e   :  { %v306_v38 = vadd.f32 %v2007_v5, %v305_v36  ;;  %v1276_v39 = vpop.f32.mrb[9].mxu0  ;;  %1363 = vmatmul.mubr.bf16.gmra.mrb[20].mxu1 %v479_v33  ;;  %v426_v52 = vadd.f32 %v2007_v5, %v425_v50  ;;  %v1336_v53 = vpop.f32.mrb[9].mxu1  ;;  %1536 = vmatprep.subr.bf16.mxu0 %v1535_v29 }
 0x16f   :  { %v308_v43 = vpop.f32.mrb[10].mxu0  ;;  %1366 = vmatprep.mubr.msk.bf16.mxu1 %vm1797_vm0, %v1796_v0  ;;  %v428_v55 = vpop.f32.mrb[10].mxu1  ;;  %v1539_v39 = vpack.c.bf16 %v800_v35, %v799_v34  ;;  %1569 = vmatpush3.bf16.msra.mxu1 %v1531_v15 }
 0x170   :  { %v309_v44 = vadd.f32 %v2007_v5, %v308_v43  ;;  %v1277_v45 = vpop.f32.mrb[11].mxu0  ;;  %v444_v47 = vmax.f32 %v306_v38, 0.0  ;;  %v474_v58 = vmax.f32 %v426_v52, 0.0  ;;  %v429_v59 = vadd.f32 %v2007_v5, %v428_v55  ;;  %v1337_v60 = vpop.f32.mrb[11].mxu1  ;;  %1562 = vmatprep.subr.bf16.mxu1 %v1535_v29  ;;  %1538 = vmatpush3.bf16.msra.mxu0 %v1535_v29  ;;  %v804_v52 = vld [vmem:[#allocation11 + $0x68] sm:$0xff] }
 0x171   :  { %1540 = vmatprep.subr.bf16.mxu0 %v1539_v39 }
 0x172   :  { %v445_v48 = vmax.f32 %v309_v44, 0.0  ;;  %v475_v7 = vmax.f32 %v429_v59, 0.0 }
 0x173   :  { %1570 = vmatpush3.bf16.msra.mxu1 %v1535_v29 }
 0x174   :  { %v480_v51 = vpack.c.bf16 %v445_v48, %v444_v47  ;;  %v2033_v13 = vpack.c.bf16 %v475_v7, %v474_v58  ;;  %v1543_v47 = vpack.c.bf16 %v802_v42, %v801_v41  ;;  %1563 = vmatprep.subr.bf16.mxu1 %v1539_v39  ;;  %1542 = vmatpush3.bf16.msra.mxu0 %v1539_v39 }
 0x175   :  { %v313_v54 = vpop.f32.mrb[12].mxu0  ;;  %v433_v14 = vpop.f32.mrb[12].mxu1 }
 0x176   :  { %v314_v56 = vadd.f32 %v2007_v5, %v313_v54  ;;  %v1280_v57 = vpop.f32.mrb[13].mxu0  ;;  %1367 = vmatmul.mubr.bf16.gmra.mrb[24].mxu1 %v480_v51  ;;  %v434_v17 = vadd.f32 %v2007_v5, %v433_v14  ;;  %v1340_v18 = vpop.f32.mrb[13].mxu1  ;;  %v803_v51 = vld [vmem:[#allocation11 + $0x60] sm:$0xff]  ;;  %1544 = vmatprep.subr.bf16.mxu0 %v1543_v47 }
 0x177   :  { %v316_v1 = vpop.f32.mrb[14].mxu0  ;;  %1370 = vmatprep.mubr.msk.bf16.mxu1 %vm1797_vm0, %v1796_v0  ;;  %v436_v22 = vpop.f32.mrb[14].mxu1  ;;  %v1547_v55 = vpack.c.bf16 %v804_v52, %v803_v51  ;;  %1571 = vmatpush3.bf16.msra.mxu1 %v1539_v39  ;;  %v806_v51 = vld [vmem:[#allocation11 + $0x78] sm:$0xff] }
 0x178   :  { %v317_v4 = vadd.f32 %v2007_v5, %v316_v1  ;;  %v1281_v6 = vpop.f32.mrb[15].mxu0  ;;  %v446_v11 = vmax.f32 %v314_v56, 0.0  ;;  %v476_v25 = vmax.f32 %v434_v17, 0.0  ;;  %v437_v26 = vadd.f32 %v2007_v5, %v436_v22  ;;  %v1341_v27 = vpop.f32.mrb[15].mxu1  ;;  %1564 = vmatprep.subr.bf16.mxu1 %v1543_v47  ;;  %1546 = vmatpush3.bf16.msra.mxu0 %v1543_v47 }
 0x179   :  { %1548 = vmatprep.subr.bf16.mxu0 %v1547_v55 }
 0x17a   :  { %v447_v12 = vmax.f32 %v317_v4, 0.0  ;;  %v477_v33 = vmax.f32 %v437_v26, 0.0 }
 0x17b   :  { %1572 = vmatpush3.bf16.msra.mxu1 %v1543_v47 }
 0x17c   :  { %v481_v16 = vpack.c.bf16 %v447_v12, %v446_v11  ;;  %v2041_v38 = vpack.c.bf16 %v477_v33, %v476_v25  ;;  %1565 = vmatprep.subr.bf16.mxu1 %v1547_v55  ;;  %1550 = vmatpush3.bf16.msra.mxu0 %v1547_v55 }
 0x17d   :  { %v321_v21 = vpop.f32.mrb[16].mxu0 }
 0x17e   :  { %v322_v23 = vadd.f32 %v2007_v5, %v321_v21  ;;  %v1284_v24 = vpop.f32.mrb[17].mxu0  ;;  %1371 = vmatmul.mubr.bf16.gmra.mrb[28].mxu1 %v481_v16 }
 0x17f   :  { %v324_v28 = vpop.f32.mrb[18].mxu0  ;;  %1374 = vmatprep.mubr.msk.bf16.mxu1 %vm1797_vm0, %v1796_v0  ;;  %1573 = vmatpush3.bf16.msra.mxu1 %v1547_v55 }
 0x180   :  { %v325_v30 = vadd.f32 %v2007_v5, %v324_v28  ;;  %v1285_v32 = vpop.f32.mrb[19].mxu0  ;;  %v448_v36 = vmax.f32 %v322_v23, 0.0 }
 0x182   :  { %v449_v37 = vmax.f32 %v325_v30, 0.0 }
 0x184   :  { %v482_v40 = vpack.c.bf16 %v449_v37, %v448_v36 }
 0x185   :  { %v329_v43 = vpop.f32.mrb[20].mxu0 }
 0x186   :  { %v330_v44 = vadd.f32 %v2007_v5, %v329_v43  ;;  %v1288_v45 = vpop.f32.mrb[21].mxu0  ;;  %1375 = vmatmul.mubr.bf16.gmra.mrb[32].mxu1 %v482_v40 }
 0x187   :  { %v332_v46 = vpop.f32.mrb[22].mxu0  ;;  %1378 = vmatprep.mubr.msk.bf16.mxu1 %vm1797_vm0, %v1796_v0 }
 0x188   :  { %v333_v48 = vadd.f32 %v2007_v5, %v332_v46  ;;  %v1289_v50 = vpop.f32.mrb[23].mxu0  ;;  %v450_v53 = vmax.f32 %v330_v44, 0.0 }
 0x189   :  { %v805_v50 = vld [vmem:[#allocation11 + $0x70] sm:$0xff] }
 0x18a   :  { %v451_v54 = vmax.f32 %v333_v48, 0.0 }
 0x18c   :  { %v483_v56 = vpack.c.bf16 %v451_v54, %v450_v53  ;;  %v1551_v54 = vpack.c.bf16 %v806_v51, %v805_v50 }
 0x18d   :  { %v337_v57 = vpop.f32.mrb[24].mxu0 }
 0x18e   :  { %v338_v58 = vadd.f32 %v2007_v5, %v337_v57  ;;  %v1292_v59 = vpop.f32.mrb[25].mxu0  ;;  %1379 = vmatmul.mubr.bf16.gmra.mrb[36].mxu1 %v483_v56  ;;  %1552 = vmatprep.subr.bf16.mxu0 %v1551_v54 }
 0x18f   :  { %v340_v60 = vpop.f32.mrb[26].mxu0  ;;  %1382 = vmatprep.mubr.msk.bf16.mxu1 %vm1797_vm0, %v1796_v0  ;;  %1566 = vmatprep.subr.bf16.mxu1 %v1551_v54 }
 0x190   :  { %v341_v61 = vadd.f32 %v2007_v5, %v340_v60  ;;  %v1293_v62 = vpop.f32.mrb[27].mxu0  ;;  %v452_v63 = vmax.f32 %v338_v58, 0.0  ;;  %1554 = vmatpush3.bf16.msra.mxu0 %v1551_v54  ;;  %1574 = vmatpush3.bf16.msra.mxu1 %v1551_v54 }
 0x192   :  { %v453_v1 = vmax.f32 %v341_v61, 0.0 }
 0x194   :  { %v484_v2 = vpack.c.bf16 %v453_v1, %v452_v63 }
 0x195   :  { %v345_v3 = vpop.f32.mrb[28].mxu0 }
 0x196   :  { %v346_v4 = vadd.f32 %v2007_v5, %v345_v3  ;;  %v1296_v6 = vpop.f32.mrb[29].mxu0  ;;  %1383 = vmatmul.mubr.bf16.gmra.mrb[40].mxu1 %v484_v2 }
 0x197   :  { %v348_v7 = vpop.f32.mrb[30].mxu0  ;;  %1386 = vmatprep.mubr.msk.bf16.mxu1 %vm1797_vm0, %v1796_v0 }
 0x198   :  { %v349_v8 = vadd.f32 %v2007_v5, %v348_v7  ;;  %v1297_v9 = vpop.f32.mrb[31].mxu0  ;;  %v454_v10 = vmax.f32 %v346_v4, 0.0 }
 0x19a   :  { %v455_v11 = vmax.f32 %v349_v8, 0.0 }
 0x19c   :  { %v485_v12 = vpack.c.bf16 %v455_v11, %v454_v10 }
 0x19d   :  { %v353_v14 = vpop.f32.mrb[32].mxu0 }
 0x19e   :  { %v354_v15 = vadd.f32 %v2007_v5, %v353_v14  ;;  %v1300_v16 = vpop.f32.mrb[33].mxu0  ;;  %1387 = vmatmul.mubr.bf16.gmra.mrb[44].mxu1 %v485_v12 }
 0x19f   :  { %v356_v17 = vpop.f32.mrb[34].mxu0  ;;  %1390 = vmatprep.mubr.msk.bf16.mxu1 %vm1797_vm0, %v1796_v0 }
 0x1a0   :  { %v357_v18 = vadd.f32 %v2007_v5, %v356_v17  ;;  %v1301_v19 = vpop.f32.mrb[35].mxu0  ;;  %v456_v20 = vmax.f32 %v354_v15, 0.0 }
 0x1a2   :  { %v457_v21 = vmax.f32 %v357_v18, 0.0 }
 0x1a4   :  { %v486_v22 = vpack.c.bf16 %v457_v21, %v456_v20 }
 0x1a5   :  { %v361_v23 = vpop.f32.mrb[36].mxu0 }
 0x1a6   :  { %v362_v24 = vadd.f32 %v2007_v5, %v361_v23  ;;  %v1304_v25 = vpop.f32.mrb[37].mxu0  ;;  %1391 = vmatmul.mubr.bf16.gmra.mrb[48].mxu1 %v486_v22 }
 0x1a7   :  { %v364_v26 = vpop.f32.mrb[38].mxu0  ;;  %1394 = vmatprep.mubr.msk.bf16.mxu1 %vm1797_vm0, %v1796_v0 }
 0x1a8   :  { %v365_v27 = vadd.f32 %v2007_v5, %v364_v26  ;;  %v1305_v28 = vpop.f32.mrb[39].mxu0  ;;  %v458_v29 = vmax.f32 %v362_v24, 0.0 }
 0x1aa   :  { %v459_v30 = vmax.f32 %v365_v27, 0.0 }
 0x1ac   :  { %v487_v32 = vpack.c.bf16 %v459_v30, %v458_v29 }
 0x1ad   :  { %v369_v33 = vpop.f32.mrb[40].mxu0 }
 0x1ae   :  { %v370_v34 = vadd.f32 %v2007_v5, %v369_v33  ;;  %v1308_v35 = vpop.f32.mrb[41].mxu0  ;;  %1395 = vmatmul.mubr.bf16.gmra.mrb[52].mxu1 %v487_v32 }
 0x1af   :  { %v372_v36 = vpop.f32.mrb[42].mxu0  ;;  %1398 = vmatprep.mubr.msk.bf16.mxu1 %vm1797_vm0, %v1796_v0 }
 0x1b0   :  { %v373_v37 = vadd.f32 %v2007_v5, %v372_v36  ;;  %v1309_v39 = vpop.f32.mrb[43].mxu0  ;;  %v460_v40 = vmax.f32 %v370_v34, 0.0 }
 0x1b2   :  { %v461_v41 = vmax.f32 %v373_v37, 0.0 }
 0x1b4   :  { %v488_v42 = vpack.c.bf16 %v461_v41, %v460_v40 }
 0x1b5   :  { %v377_v43 = vpop.f32.mrb[44].mxu0 }
 0x1b6   :  { %v378_v44 = vadd.f32 %v2007_v5, %v377_v43  ;;  %v1312_v45 = vpop.f32.mrb[45].mxu0  ;;  %1399 = vmatmul.mubr.bf16.gmra.mrb[56].mxu1 %v488_v42 }
 0x1b7   :  { %v380_v46 = vpop.f32.mrb[46].mxu0  ;;  %1402 = vmatprep.mubr.msk.bf16.mxu1 %vm1797_vm0, %v1796_v0 }
 0x1b8   :  { %v381_v47 = vadd.f32 %v2007_v5, %v380_v46  ;;  %v1313_v48 = vpop.f32.mrb[47].mxu0  ;;  %v462_v52 = vmax.f32 %v378_v44, 0.0 }
 0x1ba   :  { %v463_v53 = vmax.f32 %v381_v47, 0.0 }
 0x1bc   :  { %v489_v55 = vpack.c.bf16 %v463_v53, %v462_v52 }
 0x1bd   :  { %v385_v56 = vpop.f32.mrb[48].mxu0 }
 0x1be   :  { %v386_v57 = vadd.f32 %v2007_v5, %v385_v56  ;;  %v1316_v58 = vpop.f32.mrb[49].mxu0  ;;  %1403 = vmatmul.mubr.bf16.gmra.mrb[60].mxu1 %v489_v55 }
 0x1bf   :  { %v388_v59 = vpop.f32.mrb[50].mxu0  ;;  %1406 = vmatprep.mubr.msk.bf16.mxu1 %vm1797_vm0, %v1796_v0 }
 0x1c0   :  { %v389_v60 = vadd.f32 %v2007_v5, %v388_v59  ;;  %v1317_v61 = vpop.f32.mrb[51].mxu0  ;;  %v464_v62 = vmax.f32 %v386_v57, 0.0 }
 0x1c2   :  { %v465_v63 = vmax.f32 %v389_v60, 0.0 }
 0x1c4   :  { %v490_v1 = vpack.c.bf16 %v465_v63, %v464_v62 }
 0x1c5   :  { %v393_v2 = vpop.f32.mrb[52].mxu0 }
 0x1c6   :  { %v394_v3 = vadd.f32 %v2007_v5, %v393_v2  ;;  %v1320_v4 = vpop.f32.mrb[53].mxu0  ;;  %1407 = vmatmul.mubr.bf16.gmra.mrb[64].mxu1 %v490_v1 }
 0x1c7   :  { %v396_v6 = vpop.f32.mrb[54].mxu0  ;;  %1410 = vmatprep.mubr.msk.bf16.mxu1 %vm1797_vm0, %v1796_v0 }
 0x1c8   :  { %v397_v7 = vadd.f32 %v2007_v5, %v396_v6  ;;  %v1321_v8 = vpop.f32.mrb[55].mxu0  ;;  %v466_v9 = vmax.f32 %v394_v3, 0.0 }
 0x1ca   :  { %v467_v10 = vmax.f32 %v397_v7, 0.0 }
 0x1cc   :  { %v491_v11 = vpack.c.bf16 %v467_v10, %v466_v9 }
 0x1cd   :  { %v401_v12 = vpop.f32.mrb[56].mxu0 }
 0x1ce   :  { %v402_v14 = vadd.f32 %v2007_v5, %v401_v12  ;;  %v1324_v15 = vpop.f32.mrb[57].mxu0  ;;  %1411 = vmatmul.mubr.bf16.gmra.mrb[68].mxu1 %v491_v11 }
 0x1cf   :  { %v404_v16 = vpop.f32.mrb[58].mxu0  ;;  %1414 = vmatprep.mubr.msk.bf16.mxu1 %vm1797_vm0, %v1796_v0 }
 0x1d0   :  { %v405_v17 = vadd.f32 %v2007_v5, %v404_v16  ;;  %v1325_v18 = vpop.f32.mrb[59].mxu0  ;;  %v468_v19 = vmax.f32 %v402_v14, 0.0  ;;  %v2095_v5 = vld [vmem:[#allocation10] ss:$0 sm:$0xff] }
 0x1d2   :  { %v469_v20 = vmax.f32 %v405_v17, 0.0 }
 0x1d4   :  { %v492_v21 = vpack.c.bf16 %v469_v20, %v468_v19 }
 0x1d6   :  { %1415 = vmatmul.mubr.bf16.gmra.mrb[72].mxu1 %v492_v21 }
 0x1d7   :  { %1418 = vmatprep.mubr.msk.bf16.mxu1 %vm1797_vm0, %v1796_v0 }
 0x1de   :  { %1419 = vmatmul.mubr.bf16.gmra.mrb[76].mxu1 %v2017_v31 }
 0x1df   :  { %1422 = vmatprep.mubr.msk.bf16.mxu1 %vm1797_vm0, %v1796_v0 }
 0x1e6   :  { %1423 = vmatmul.mubr.bf16.gmra.mrb[80].mxu1 %v2025_v49 }
 0x1e7   :  { %1426 = vmatprep.mubr.msk.bf16.mxu1 %vm1797_vm0, %v1796_v0 }
 0x1ee   :  { %1427 = vmatmul.mubr.bf16.gmra.mrb[84].mxu1 %v2033_v13 }
 0x1ef   :  { %1430 = vmatprep.mubr.msk.bf16.mxu1 %vm1797_vm0, %v1796_v0 }
 0x1f6   :  { %1431 = vmatmul.mubr.bf16.gmra.mrb[88].mxu1 %v2041_v38 }
 0x239   :  { %v602_v22 = vpop.f32.mrb[16].mxu1 }
 0x23a   :  { %v603_v31 = vadd.f32 %v2095_v5, %v602_v22  ;;  %v1360_v23 = vpop.f32.mrb[17].mxu1 }
 0x23b   :  { %v605_v24 = vpop.f32.mrb[18].mxu1 }
 0x23c   :  { %v753_v25 = vmax.f32 %v603_v31, 0.0  ;;  %v606_v49 = vadd.f32 %v2095_v5, %v605_v24  ;;  %v1361_v26 = vpop.f32.mrb[19].mxu1 }
 0x23e   :  { %v754_v27 = vmax.f32 %v606_v49, 0.0  ;;  %1466 = vmatprep.mubr.f32.mxu0 %v753_v25 }
 0x240   :  { %1467 = vmatmul.mubr.f32.vlgmr.msra.gmra.mrb[60].mxu0 %v754_v27 }
 0x241   :  { %v610_v13 = vpop.f32.mrb[20].mxu1 }
 0x242   :  { %v611_v28 = vadd.f32 %v2095_v5, %v610_v13  ;;  %v1364_v0 = vpop.f32.mrb[21].mxu1 }
 0x243   :  { %v613_v29 = vpop.f32.mrb[22].mxu1 }
 0x244   :  { %v755_v38 = vmax.f32 %v611_v28, 0.0  ;;  %v614_v30 = vadd.f32 %v2095_v5, %v613_v29  ;;  %v1365_v32 = vpop.f32.mrb[23].mxu1 }
 0x246   :  { %v756_v33 = vmax.f32 %v614_v30, 0.0  ;;  %1469 = vmatprep.mubr.f32.mxu0 %v755_v38 }
 0x248   :  { %1470 = vmatmul.mubr.f32.gmra.mrb[62].mxu0 %v756_v33 }
 0x249   :  { %v618_v34 = vpop.f32.mrb[24].mxu1 }
 0x24a   :  { %v619_v35 = vadd.f32 %v2095_v5, %v618_v34  ;;  %v1368_v36 = vpop.f32.mrb[25].mxu1 }
 0x24b   :  { %v621_v37 = vpop.f32.mrb[26].mxu1 }
 0x24c   :  { %v757_v39 = vmax.f32 %v619_v35, 0.0  ;;  %v622_v40 = vadd.f32 %v2095_v5, %v621_v37  ;;  %v1369_v41 = vpop.f32.mrb[27].mxu1 }
 0x24e   :  { %v758_v42 = vmax.f32 %v622_v40, 0.0  ;;  %1472 = vmatprep.mubr.f32.mxu0 %v757_v39 }
 0x250   :  { %1473 = vmatmul.mubr.f32.gmra.mrb[64].mxu0 %v758_v42 }
 0x251   :  { %v626_v43 = vpop.f32.mrb[28].mxu1 }
 0x252   :  { %v627_v44 = vadd.f32 %v2095_v5, %v626_v43  ;;  %v1372_v45 = vpop.f32.mrb[29].mxu1 }
 0x253   :  { %v629_v46 = vpop.f32.mrb[30].mxu1 }
 0x254   :  { %v759_v47 = vmax.f32 %v627_v44, 0.0  ;;  %v630_v48 = vadd.f32 %v2095_v5, %v629_v46  ;;  %v1373_v50 = vpop.f32.mrb[31].mxu1 }
 0x256   :  { %v760_v51 = vmax.f32 %v630_v48, 0.0  ;;  %1475 = vmatprep.mubr.f32.mxu0 %v759_v47 }
 0x258   :  { %1476 = vmatmul.mubr.f32.gmra.mrb[66].mxu0 %v760_v51 }
 0x259   :  { %v634_v52 = vpop.f32.mrb[32].mxu1 }
 0x25a   :  { %v635_v53 = vadd.f32 %v2095_v5, %v634_v52  ;;  %v1376_v54 = vpop.f32.mrb[33].mxu1 }
 0x25b   :  { %v637_v55 = vpop.f32.mrb[34].mxu1 }
 0x25c   :  { %v761_v56 = vmax.f32 %v635_v53, 0.0  ;;  %v638_v57 = vadd.f32 %v2095_v5, %v637_v55  ;;  %v1377_v58 = vpop.f32.mrb[35].mxu1 }
 0x25e   :  { %v762_v59 = vmax.f32 %v638_v57, 0.0  ;;  %1478 = vmatprep.mubr.f32.mxu0 %v761_v56 }
 0x260   :  { %1479 = vmatmul.mubr.f32.gmra.mrb[68].mxu0 %v762_v59 }
 0x261   :  { %v642_v60 = vpop.f32.mrb[36].mxu1 }
 0x262   :  { %v643_v61 = vadd.f32 %v2095_v5, %v642_v60  ;;  %v1380_v62 = vpop.f32.mrb[37].mxu1 }
 0x263   :  { %v645_v63 = vpop.f32.mrb[38].mxu1 }
 0x264   :  { %v763_v1 = vmax.f32 %v643_v61, 0.0  ;;  %v646_v2 = vadd.f32 %v2095_v5, %v645_v63  ;;  %v1381_v3 = vpop.f32.mrb[39].mxu1 }
 0x266   :  { %v764_v4 = vmax.f32 %v646_v2, 0.0  ;;  %1481 = vmatprep.mubr.f32.mxu0 %v763_v1 }
 0x268   :  { %1482 = vmatmul.mubr.f32.gmra.mrb[70].mxu0 %v764_v4 }
 0x269   :  { %v650_v6 = vpop.f32.mrb[40].mxu1 }
 0x26a   :  { %v651_v7 = vadd.f32 %v2095_v5, %v650_v6  ;;  %v1384_v8 = vpop.f32.mrb[41].mxu1 }
 0x26b   :  { %v653_v9 = vpop.f32.mrb[42].mxu1 }
 0x26c   :  { %v765_v10 = vmax.f32 %v651_v7, 0.0  ;;  %v654_v11 = vadd.f32 %v2095_v5, %v653_v9  ;;  %v1385_v12 = vpop.f32.mrb[43].mxu1 }
 0x26e   :  { %v766_v14 = vmax.f32 %v654_v11, 0.0  ;;  %1484 = vmatprep.mubr.f32.mxu0 %v765_v10 }
 0x270   :  { %1485 = vmatmul.mubr.f32.gmra.mrb[72].mxu0 %v766_v14 }
 0x271   :  { %v658_v15 = vpop.f32.mrb[44].mxu1 }
 0x272   :  { %v659_v16 = vadd.f32 %v2095_v5, %v658_v15  ;;  %v1388_v17 = vpop.f32.mrb[45].mxu1 }
 0x273   :  { %v661_v18 = vpop.f32.mrb[46].mxu1 }
 0x274   :  { %v767_v19 = vmax.f32 %v659_v16, 0.0  ;;  %v662_v20 = vadd.f32 %v2095_v5, %v661_v18  ;;  %v1389_v21 = vpop.f32.mrb[47].mxu1 }
 0x276   :  { %v768_v22 = vmax.f32 %v662_v20, 0.0  ;;  %1487 = vmatprep.mubr.f32.mxu0 %v767_v19 }
 0x278   :  { %1488 = vmatmul.mubr.f32.gmra.mrb[74].mxu0 %v768_v22 }
 0x279   :  { %v666_v31 = vpop.f32.mrb[48].mxu1 }
 0x27a   :  { %v667_v23 = vadd.f32 %v2095_v5, %v666_v31  ;;  %v1392_v24 = vpop.f32.mrb[49].mxu1 }
 0x27b   :  { %v669_v25 = vpop.f32.mrb[50].mxu1 }
 0x27c   :  { %v769_v49 = vmax.f32 %v667_v23, 0.0  ;;  %v670_v26 = vadd.f32 %v2095_v5, %v669_v25  ;;  %v1393_v27 = vpop.f32.mrb[51].mxu1 }
 0x27e   :  { %v770_v13 = vmax.f32 %v670_v26, 0.0  ;;  %1490 = vmatprep.mubr.f32.mxu0 %v769_v49 }
 0x280   :  { %1491 = vmatmul.mubr.f32.gmra.mrb[76].mxu0 %v770_v13 }
 0x281   :  { %v674_v28 = vpop.f32.mrb[52].mxu1 }
 0x282   :  { %v675_v0 = vadd.f32 %v2095_v5, %v674_v28  ;;  %v1396_v29 = vpop.f32.mrb[53].mxu1 }
 0x283   :  { %v677_v38 = vpop.f32.mrb[54].mxu1 }
 0x284   :  { %v771_v30 = vmax.f32 %v675_v0, 0.0  ;;  %v678_v32 = vadd.f32 %v2095_v5, %v677_v38  ;;  %v1397_v33 = vpop.f32.mrb[55].mxu1 }
 0x286   :  { %v772_v34 = vmax.f32 %v678_v32, 0.0  ;;  %1493 = vmatprep.mubr.f32.mxu0 %v771_v30 }
 0x288   :  { %1494 = vmatmul.mubr.f32.gmra.mrb[78].mxu0 %v772_v34 }
 0x289   :  { %v682_v35 = vpop.f32.mrb[56].mxu1 }
 0x28a   :  { %v683_v36 = vadd.f32 %v2095_v5, %v682_v35  ;;  %v1400_v37 = vpop.f32.mrb[57].mxu1 }
 0x28b   :  { %v685_v39 = vpop.f32.mrb[58].mxu1 }
 0x28c   :  { %v773_v40 = vmax.f32 %v683_v36, 0.0  ;;  %v686_v41 = vadd.f32 %v2095_v5, %v685_v39  ;;  %v1401_v42 = vpop.f32.mrb[59].mxu1 }
 0x28e   :  { %v774_v43 = vmax.f32 %v686_v41, 0.0  ;;  %1496 = vmatprep.mubr.f32.mxu0 %v773_v40 }
 0x290   :  { %1497 = vmatmul.mubr.f32.gmra.mrb[80].mxu0 %v774_v43 }
 0x291   :  { %v690_v44 = vpop.f32.mrb[60].mxu1 }
 0x292   :  { %v691_v45 = vadd.f32 %v2095_v5, %v690_v44  ;;  %v1404_v46 = vpop.f32.mrb[61].mxu1 }
 0x293   :  { %v693_v47 = vpop.f32.mrb[62].mxu1 }
 0x294   :  { %v775_v48 = vmax.f32 %v691_v45, 0.0  ;;  %v694_v50 = vadd.f32 %v2095_v5, %v693_v47  ;;  %v1405_v51 = vpop.f32.mrb[63].mxu1  ;;  %v2135_v45 = vld [vmem:[#allocation13] ss:$0 sm:$0xff] }
 0x296   :  { %v776_v52 = vmax.f32 %v694_v50, 0.0  ;;  %1499 = vmatprep.mubr.f32.mxu0 %v775_v48 }
 0x298   :  { %1500 = vmatmul.mubr.f32.gmra.mrb[82].mxu0 %v776_v52 }
 0x299   :  { %v698_v53 = vpop.f32.mrb[64].mxu1 }
 0x29a   :  { %v699_v54 = vadd.f32 %v2095_v5, %v698_v53  ;;  %v1408_v55 = vpop.f32.mrb[65].mxu1 }
 0x29b   :  { %v701_v56 = vpop.f32.mrb[66].mxu1 }
 0x29c   :  { %v777_v57 = vmax.f32 %v699_v54, 0.0  ;;  %v702_v58 = vadd.f32 %v2095_v5, %v701_v56  ;;  %v1409_v59 = vpop.f32.mrb[67].mxu1 }
 0x29e   :  { %v778_v60 = vmax.f32 %v702_v58, 0.0  ;;  %1502 = vmatprep.mubr.f32.mxu0 %v777_v57 }
 0x2a0   :  { %1503 = vmatmul.mubr.f32.gmra.mrb[84].mxu0 %v778_v60 }
 0x2a1   :  { %v706_v61 = vpop.f32.mrb[68].mxu1 }
 0x2a2   :  { %v707_v62 = vadd.f32 %v2095_v5, %v706_v61  ;;  %v1412_v63 = vpop.f32.mrb[69].mxu1 }
 0x2a3   :  { %v709_v1 = vpop.f32.mrb[70].mxu1 }
 0x2a4   :  { %v779_v2 = vmax.f32 %v707_v62, 0.0  ;;  %v710_v3 = vadd.f32 %v2095_v5, %v709_v1  ;;  %v1413_v4 = vpop.f32.mrb[71].mxu1 }
 0x2a6   :  { %v780_v6 = vmax.f32 %v710_v3, 0.0  ;;  %1505 = vmatprep.mubr.f32.mxu0 %v779_v2 }
 0x2a8   :  { %1506 = vmatmul.mubr.f32.gmra.mrb[86].mxu0 %v780_v6 }
 0x2a9   :  { %v714_v7 = vpop.f32.mrb[72].mxu1 }
 0x2aa   :  { %v715_v8 = vadd.f32 %v2095_v5, %v714_v7  ;;  %v1416_v9 = vpop.f32.mrb[73].mxu1 }
 0x2ab   :  { %v717_v10 = vpop.f32.mrb[74].mxu1 }
 0x2ac   :  { %v781_v11 = vmax.f32 %v715_v8, 0.0  ;;  %v718_v12 = vadd.f32 %v2095_v5, %v717_v10  ;;  %v1417_v14 = vpop.f32.mrb[75].mxu1 }
 0x2ae   :  { %v782_v15 = vmax.f32 %v718_v12, 0.0  ;;  %1508 = vmatprep.mubr.f32.mxu0 %v781_v11 }
 0x2b0   :  { %1509 = vmatmul.mubr.f32.gmra.mrb[88].mxu0 %v782_v15 }
 0x2b1   :  { %v722_v16 = vpop.f32.mrb[76].mxu1 }
 0x2b2   :  { %v723_v17 = vadd.f32 %v2095_v5, %v722_v16  ;;  %v1420_v18 = vpop.f32.mrb[77].mxu1 }
 0x2b3   :  { %v725_v19 = vpop.f32.mrb[78].mxu1 }
 0x2b4   :  { %v783_v20 = vmax.f32 %v723_v17, 0.0  ;;  %v726_v21 = vadd.f32 %v2095_v5, %v725_v19  ;;  %v1421_v22 = vpop.f32.mrb[79].mxu1 }
 0x2b6   :  { %v784_v31 = vmax.f32 %v726_v21, 0.0  ;;  %1511 = vmatprep.mubr.f32.mxu0 %v783_v20 }
 0x2b8   :  { %1512 = vmatmul.mubr.f32.gmra.mrb[90].mxu0 %v784_v31 }
 0x2b9   :  { %v730_v23 = vpop.f32.mrb[80].mxu1 }
 0x2ba   :  { %v731_v24 = vadd.f32 %v2095_v5, %v730_v23  ;;  %v1424_v25 = vpop.f32.mrb[81].mxu1 }
 0x2bb   :  { %v733_v49 = vpop.f32.mrb[82].mxu1 }
 0x2bc   :  { %v785_v26 = vmax.f32 %v731_v24, 0.0  ;;  %v734_v27 = vadd.f32 %v2095_v5, %v733_v49  ;;  %v1425_v13 = vpop.f32.mrb[83].mxu1 }
 0x2be   :  { %v786_v28 = vmax.f32 %v734_v27, 0.0  ;;  %1514 = vmatprep.mubr.f32.mxu0 %v785_v26 }
 0x2c0   :  { %1515 = vmatmul.mubr.f32.gmra.mrb[92].mxu0 %v786_v28 }
 0x2c1   :  { %v738_v0 = vpop.f32.mrb[84].mxu1 }
 0x2c2   :  { %v739_v29 = vadd.f32 %v2095_v5, %v738_v0  ;;  %v1428_v38 = vpop.f32.mrb[85].mxu1 }
 0x2c3   :  { %v741_v30 = vpop.f32.mrb[86].mxu1 }
 0x2c4   :  { %v787_v32 = vmax.f32 %v739_v29, 0.0  ;;  %v742_v33 = vadd.f32 %v2095_v5, %v741_v30  ;;  %v1429_v34 = vpop.f32.mrb[87].mxu1 }
 0x2c6   :  { %v788_v35 = vmax.f32 %v742_v33, 0.0  ;;  %1517 = vmatprep.mubr.f32.mxu0 %v787_v32 }
 0x2c8   :  { %1518 = vmatmul.mubr.f32.gmra.mrb[94].mxu0 %v788_v35 }
 0x2c9   :  { %v746_v36 = vpop.f32.mrb[88].mxu1 }
 0x2ca   :  { %v747_v37 = vadd.f32 %v2095_v5, %v746_v36  ;;  %v1432_v39 = vpop.f32.mrb[89].mxu1 }
 0x2cb   :  { %v749_v40 = vpop.f32.mrb[90].mxu1 }
 0x2cc   :  { %v789_v41 = vmax.f32 %v747_v37, 0.0  ;;  %v750_v42 = vadd.f32 %v2095_v5, %v749_v40  ;;  %v1433_v43 = vpop.f32.mrb[91].mxu1 }
 0x2ce   :  { %v790_v44 = vmax.f32 %v750_v42, 0.0  ;;  %1520 = vmatprep.mubr.f32.mxu1 %v789_v41 }
 0x2d0   :  { %1521 = vmatmul.mubr.f32.vlgmr.msra.gmra.mrb[92].mxu1 %v790_v44 }
 0x313   :  { %v1468_v46 = vpop.f32.mrb[60].mxu0 }
 0x314   :  { %v886_v47 = vadd.f32 %v1468_v46, %v2135_v45  ;;  %v880_v48 = vpop.f32.mrb[61].mxu0 }
 0x315   :  { %v881_v50 = vadd.f32 %v2135_v45, %v880_v48 }
 0x316   :  { %1071 = vst.msk [vmem:[#allocation14 + $0x8] sm:$0xff] %vm1069_vm2, %v886_v47 }
 0x317   :  { %1070 = vst.msk [vmem:[#allocation14] sm:$0xff] %vm1069_vm2, %v881_v50 }
 0x31b   :  { %v1471_v51 = vpop.f32.mrb[62].mxu0 }
 0x31c   :  { %v896_v5 = vadd.f32 %v1471_v51, %v2135_v45  ;;  %v890_v52 = vpop.f32.mrb[63].mxu0 }
 0x31d   :  { %v891_v53 = vadd.f32 %v2135_v45, %v890_v52 }
 0x31e   :  { %1073 = vst.msk [vmem:[#allocation14 + $0x18] sm:$0xff] %vm1069_vm2, %v896_v5 }
 0x31f   :  { %1072 = vst.msk [vmem:[#allocation14 + $0x10] sm:$0xff] %vm1069_vm2, %v891_v53 }
 0x323   :  { %v1474_v54 = vpop.f32.mrb[64].mxu0 }
 0x324   :  { %v906_v55 = vadd.f32 %v1474_v54, %v2135_v45  ;;  %v900_v56 = vpop.f32.mrb[65].mxu0 }
 0x325   :  { %v901_v57 = vadd.f32 %v2135_v45, %v900_v56 }
 0x326   :  { %1075 = vst.msk [vmem:[#allocation14 + $0x28] sm:$0xff] %vm1069_vm2, %v906_v55 }
 0x327   :  { %1074 = vst.msk [vmem:[#allocation14 + $0x20] sm:$0xff] %vm1069_vm2, %v901_v57 }
 0x32b   :  { %v1477_v58 = vpop.f32.mrb[66].mxu0 }
 0x32c   :  { %v916_v59 = vadd.f32 %v1477_v58, %v2135_v45  ;;  %v910_v60 = vpop.f32.mrb[67].mxu0 }
 0x32d   :  { %v911_v61 = vadd.f32 %v2135_v45, %v910_v60 }
 0x32e   :  { %1077 = vst.msk [vmem:[#allocation14 + $0x38] sm:$0xff] %vm1069_vm2, %v916_v59 }
 0x32f   :  { %1076 = vst.msk [vmem:[#allocation14 + $0x30] sm:$0xff] %vm1069_vm2, %v911_v61 }
 0x333   :  { %v1480_v62 = vpop.f32.mrb[68].mxu0 }
 0x334   :  { %v926_v63 = vadd.f32 %v1480_v62, %v2135_v45  ;;  %v920_v1 = vpop.f32.mrb[69].mxu0 }
 0x335   :  { %v921_v2 = vadd.f32 %v2135_v45, %v920_v1 }
 0x336   :  { %1079 = vst.msk [vmem:[#allocation14 + $0x48] sm:$0xff] %vm1069_vm2, %v926_v63 }
 0x337   :  { %1078 = vst.msk [vmem:[#allocation14 + $0x40] sm:$0xff] %vm1069_vm2, %v921_v2 }
 0x33b   :  { %v1483_v3 = vpop.f32.mrb[70].mxu0 }
 0x33c   :  { %v936_v4 = vadd.f32 %v1483_v3, %v2135_v45  ;;  %v930_v6 = vpop.f32.mrb[71].mxu0 }
 0x33d   :  { %v931_v7 = vadd.f32 %v2135_v45, %v930_v6 }
 0x33e   :  { %1081 = vst.msk [vmem:[#allocation14 + $0x58] sm:$0xff] %vm1069_vm2, %v936_v4 }
 0x33f   :  { %1080 = vst.msk [vmem:[#allocation14 + $0x50] sm:$0xff] %vm1069_vm2, %v931_v7 }
 0x343   :  { %v1486_v8 = vpop.f32.mrb[72].mxu0 }
 0x344   :  { %v946_v9 = vadd.f32 %v1486_v8, %v2135_v45  ;;  %v940_v10 = vpop.f32.mrb[73].mxu0 }
 0x345   :  { %v941_v11 = vadd.f32 %v2135_v45, %v940_v10 }
 0x346   :  { %1083 = vst.msk [vmem:[#allocation14 + $0x68] sm:$0xff] %vm1069_vm2, %v946_v9 }
 0x347   :  { %1082 = vst.msk [vmem:[#allocation14 + $0x60] sm:$0xff] %vm1069_vm2, %v941_v11 }
 0x34b   :  { %v1489_v12 = vpop.f32.mrb[74].mxu0 }
 0x34c   :  { %v956_v14 = vadd.f32 %v1489_v12, %v2135_v45  ;;  %v950_v15 = vpop.f32.mrb[75].mxu0 }
 0x34d   :  { %v951_v16 = vadd.f32 %v2135_v45, %v950_v15 }
 0x34e   :  { %1085 = vst.msk [vmem:[#allocation14 + $0x78] sm:$0xff] %vm1069_vm2, %v956_v14 }
 0x34f   :  { %1084 = vst.msk [vmem:[#allocation14 + $0x70] sm:$0xff] %vm1069_vm2, %v951_v16 }
 0x353   :  { %v1492_v17 = vpop.f32.mrb[76].mxu0 }
 0x354   :  { %v966_v18 = vadd.f32 %v1492_v17, %v2135_v45  ;;  %v960_v19 = vpop.f32.mrb[77].mxu0 }
 0x355   :  { %v961_v20 = vadd.f32 %v2135_v45, %v960_v19 }
 0x356   :  { %1087 = vst.msk [vmem:[#allocation14 + $0x88] sm:$0xff] %vm1069_vm2, %v966_v18 }
 0x357   :  { %1086 = vst.msk [vmem:[#allocation14 + $0x80] sm:$0xff] %vm1069_vm2, %v961_v20 }
 0x35b   :  { %v1495_v21 = vpop.f32.mrb[78].mxu0 }
 0x35c   :  { %v976_v22 = vadd.f32 %v1495_v21, %v2135_v45  ;;  %v970_v31 = vpop.f32.mrb[79].mxu0 }
 0x35d   :  { %v971_v23 = vadd.f32 %v2135_v45, %v970_v31 }
 0x35e   :  { %1089 = vst.msk [vmem:[#allocation14 + $0x98] sm:$0xff] %vm1069_vm2, %v976_v22 }
 0x35f   :  { %1088 = vst.msk [vmem:[#allocation14 + $0x90] sm:$0xff] %vm1069_vm2, %v971_v23 }
 0x363   :  { %v1498_v24 = vpop.f32.mrb[80].mxu0 }
 0x364   :  { %v986_v25 = vadd.f32 %v1498_v24, %v2135_v45  ;;  %v980_v49 = vpop.f32.mrb[81].mxu0 }
 0x365   :  { %v981_v26 = vadd.f32 %v2135_v45, %v980_v49 }
 0x366   :  { %1091 = vst.msk [vmem:[#allocation14 + $0xa8] sm:$0xff] %vm1069_vm2, %v986_v25 }
 0x367   :  { %1090 = vst.msk [vmem:[#allocation14 + $0xa0] sm:$0xff] %vm1069_vm2, %v981_v26 }
 0x36b   :  { %v1501_v27 = vpop.f32.mrb[82].mxu0 }
 0x36c   :  { %v996_v13 = vadd.f32 %v1501_v27, %v2135_v45  ;;  %v990_v28 = vpop.f32.mrb[83].mxu0 }
 0x36d   :  { %v991_v0 = vadd.f32 %v2135_v45, %v990_v28 }
 0x36e   :  { %1093 = vst.msk [vmem:[#allocation14 + $0xb8] sm:$0xff] %vm1069_vm2, %v996_v13 }
 0x36f   :  { %1092 = vst.msk [vmem:[#allocation14 + $0xb0] sm:$0xff] %vm1069_vm2, %v991_v0 }
 0x373   :  { %v1504_v29 = vpop.f32.mrb[84].mxu0 }
 0x374   :  { %v1006_v38 = vadd.f32 %v1504_v29, %v2135_v45  ;;  %v1000_v30 = vpop.f32.mrb[85].mxu0 }
 0x375   :  { %v1001_v32 = vadd.f32 %v2135_v45, %v1000_v30 }
 0x376   :  { %1095 = vst.msk [vmem:[#allocation14 + $0xc8] sm:$0xff] %vm1069_vm2, %v1006_v38 }
 0x377   :  { %1094 = vst.msk [vmem:[#allocation14 + $0xc0] sm:$0xff] %vm1069_vm2, %v1001_v32 }
 0x37b   :  { %v1507_v33 = vpop.f32.mrb[86].mxu0 }
 0x37c   :  { %v1016_v34 = vadd.f32 %v1507_v33, %v2135_v45  ;;  %v1010_v35 = vpop.f32.mrb[87].mxu0 }
 0x37d   :  { %v1011_v36 = vadd.f32 %v2135_v45, %v1010_v35 }
 0x37e   :  { %1097 = vst.msk [vmem:[#allocation14 + $0xd8] sm:$0xff] %vm1069_vm2, %v1016_v34 }
 0x37f   :  { %1096 = vst.msk [vmem:[#allocation14 + $0xd0] sm:$0xff] %vm1069_vm2, %v1011_v36 }
 0x383   :  { %v1510_v37 = vpop.f32.mrb[88].mxu0 }
 0x384   :  { %v1026_v39 = vadd.f32 %v1510_v37, %v2135_v45  ;;  %v1020_v40 = vpop.f32.mrb[89].mxu0 }
 0x385   :  { %v1021_v41 = vadd.f32 %v2135_v45, %v1020_v40 }
 0x386   :  { %1099 = vst.msk [vmem:[#allocation14 + $0xe8] sm:$0xff] %vm1069_vm2, %v1026_v39 }
 0x387   :  { %1098 = vst.msk [vmem:[#allocation14 + $0xe0] sm:$0xff] %vm1069_vm2, %v1021_v41 }
 0x38b   :  { %v1513_v42 = vpop.f32.mrb[90].mxu0 }
 0x38c   :  { %v1036_v43 = vadd.f32 %v1513_v42, %v2135_v45  ;;  %v1030_v44 = vpop.f32.mrb[91].mxu0 }
 0x38d   :  { %v1031_v46 = vadd.f32 %v2135_v45, %v1030_v44 }
 0x38e   :  { %1101 = vst.msk [vmem:[#allocation14 + $0xf8] sm:$0xff] %vm1069_vm2, %v1036_v43 }
 0x38f   :  { %1100 = vst.msk [vmem:[#allocation14 + $0xf0] sm:$0xff] %vm1069_vm2, %v1031_v46 }
 0x393   :  { %v1516_v47 = vpop.f32.mrb[92].mxu0 }
 0x394   :  { %v1046_v48 = vadd.f32 %v1516_v47, %v2135_v45  ;;  %v1040_v50 = vpop.f32.mrb[93].mxu0 }
 0x395   :  { %v1041_v51 = vadd.f32 %v2135_v45, %v1040_v50 }
 0x396   :  { %1103 = vst.msk [vmem:[#allocation14 + $0x108] sm:$0xff] %vm1069_vm2, %v1046_v48 }
 0x397   :  { %1102 = vst.msk [vmem:[#allocation14 + $0x100] sm:$0xff] %vm1069_vm2, %v1041_v51 }
 0x39b   :  { %v1519_v5 = vpop.f32.mrb[94].mxu0 }
 0x39c   :  { %v1056_v52 = vadd.f32 %v1519_v5, %v2135_v45  ;;  %v1050_v53 = vpop.f32.mrb[95].mxu0 }
 0x39d   :  { %v1051_v54 = vadd.f32 %v2135_v45, %v1050_v53 }
 0x39e   :  { %1105 = vst.msk [vmem:[#allocation14 + $0x118] sm:$0xff] %vm1069_vm2, %v1056_v52 }
 0x39f   :  { %1104 = vst.msk [vmem:[#allocation14 + $0x110] sm:$0xff] %vm1069_vm2, %v1051_v54 }
 0x3a3   :  { %v1522_v55 = vpop.f32.mrb[92].mxu1 }
 0x3a4   :  { %v1066_v56 = vadd.f32 %v1522_v55, %v2135_v45  ;;  %v1060_v57 = vpop.f32.mrb[93].mxu1 }
 0x3a5   :  { %v1061_v58 = vadd.f32 %v2135_v45, %v1060_v57 }
 0x3a6   :  { %1107 = vst.msk [vmem:[#allocation14 + $0x128] sm:$0xff] %vm1069_vm2, %v1066_v56 }
 0x3a7   :  { %1106 = vst.msk [vmem:[#allocation14 + $0x120] sm:$0xff] %vm1069_vm2, %v1061_v58 }
 0x3a8   :  { %1764 = shalt.err (!%p1761_p4)
}
 0x3a9   :  { %s1765_s19 = scalar_lea.hbm %s2235_s7, 4864 }
 0x3aa   :  { %p1766_p5 = scmp.ne.s32.totalorder %s2235_s7, %s1765_s19  ;;  %p1769_p6 = scmp.lt.u32.totalorder %s1765_s19, %s2235_s7 }
 0x3ac   :  { %p1771_p7 = pnand %p1769_p6, %p1766_p5 }
 0x3ae   :  { %1774 = shalt.err (!%p1771_p7)
}
 0x3af   :  { %1119 = dma.vmem_to_hbm [thread:$0]  %s1114_s29, 4864, %s2235_s7, [#allocation4], %s1791_s11, %s1791_s11, %s1792_s12  }
 0x3b0   :  { %1783 = dma.done.wait [#allocation4], 4864  }
 0x3b1   :  { %1784 = vsyncadd [#allocation4], 4294962432 }
 0x3b2   :  { %1123 = vsyncpa [#allocation3], 1 }
 0x3b3   :  { %1124 = vsyncpa [#allocation6], 1 }
 0x3b4   :  { %1125 = vsyncpa [#allocation9], 1 }
 0x3b5   :  { %1126 = vsyncpa [#allocation12], 1 }
 0x3b6   :  { %1127 = vsyncpa [#allocation4], 1 }

// kernel: tpu_custom_call.1
= control target key start
LH: loop header
LB: loop body
LE: loop exit
PB: predicated region body
PF: predicated region fallthrough
CT: control target
= control target key end

     0   :  { %12 = vsyncpa [#allocation3], 0  ;;  %s2228_s0 = inlined_call_operand.hbm [shape: f32[300,32], index: 0, kind: input, shape index: {}]   ;;  %s2229_s1 = inlined_call_operand.hbm [shape: bf16[32,128], index: 1, kind: input, shape index: {}]   ;;  %s2230_s2 = inlined_call_operand.hbm [shape: f32[1,128], index: 2, kind: input, shape index: {}]   ;;  %s2231_s3 = inlined_call_operand.hbm [shape: bf16[128,128], index: 3, kind: input, shape index: {}]   ;;  %s2232_s4 = inlined_call_operand.hbm [shape: f32[1,128], index: 4, kind: input, shape index: {}]   ;;  %s2233_s5 = inlined_call_operand.hbm [shape: f32[128,4], index: 5, kind: input, shape index: {}]   ;;  %s2234_s6 = inlined_call_operand.hbm [shape: f32[1,4], index: 6, kind: input, shape index: {}]   ;;  %s2235_s7 = inlined_call_operand.hbm [shape: f32[300,4], index: 7, kind: output, shape index: {}]  }
   0x1   :  { %13 = vsyncpa [#allocation6], 0 }
   0x2   :  { %14 = vsyncpa [#allocation9], 0 }
   0x3   :  { %15 = vsyncpa [#allocation12], 0 }
   0x4   :  { %16 = vsyncpa [#allocation4], 0  ;;  %s1785_s24 = smov [#allocation5]   ;;  %s1599_s28 = scalar_lea.hbm %s2229_s1, 256 }
   0x5   :  { %s34_s25 = sshll.u32 %s1785_s24, 4  ;;  %p1600_p0 = scmp.ne.s32.totalorder %s2229_s1, %s1599_s28  ;;  %s35_s25 = int_to_ptr.vmem [resolvable:$true] %s34_s25 }
   0x6   :  { %p1603_p1 = scmp.lt.u32.totalorder %s1599_s28, %s2229_s1 }
   0x8   :  { %p1605_p2 = pnand %p1603_p1, %p1600_p0 }
   0xa   :  { %1608 = shalt.err (!%p1605_p2)
}
   0xb   :  { %s1609_s10 = scalar_lea.vmem %s35_s25, 256  ;;  %p1614_p4 = scmp.lt.s32.totalorder %s35_s25, %s35_s25 }
   0xc   :  { %p1610_p3 = scmp.ne.s32.totalorder %s35_s25, %s1609_s10  ;;  %p1615_p5 = scmp.lt.s32.totalorder %s1609_s10, %s1609_s10 }
   0xe   :  { %p1616_p6 = por %p1615_p5, %p1614_p4 }
  0x10   :  { %p1617_p7 = pnand %p1616_p6, %p1610_p3 }
  0x12   :  { %1620 = shalt.err (!%p1617_p7)
}
  0x13   :  { %s1786_s11 = smov 64   ;;  %s1787_s12 = smov 4  }
  0x14   :  { %40 = dma.hbm_to_vmem [thread:$0]  %s2229_s1, 256, %s35_s25, [#allocation6], %s1786_s11, %s1786_s11, %s1787_s12  }
  0x15   :  { %s1788_s15 = smov [#allocation8]   ;;  %s1621_s19 = scalar_lea.hbm %s2231_s3, 1024 }
  0x16   :  { %s56_s16 = sshll.u32 %s1788_s15, 4  ;;  %p1622_p8 = scmp.ne.s32.totalorder %s2231_s3, %s1621_s19  ;;  %s57_s16 = int_to_ptr.vmem [resolvable:$true] %s56_s16 }
  0x17   :  { %p1625_p9 = scmp.lt.u32.totalorder %s1621_s19, %s2231_s3 }
  0x19   :  { %p1627_p10 = pnand %p1625_p9, %p1622_p8 }
  0x1b   :  { %1630 = shalt.err (!%p1627_p10)
}
  0x1c   :  { %s1631_s24 = scalar_lea.vmem %s57_s16, 1024  ;;  %p1636_p12 = scmp.lt.s32.totalorder %s57_s16, %s57_s16 }
  0x1d   :  { %p1632_p11 = scmp.ne.s32.totalorder %s57_s16, %s1631_s24  ;;  %p1637_p13 = scmp.lt.s32.totalorder %s1631_s24, %s1631_s24 }
  0x1f   :  { %p1638_p0 = por %p1637_p13, %p1636_p12 }
  0x21   :  { %p1639_p1 = pnand %p1638_p0, %p1632_p11 }
  0x23   :  { %1642 = shalt.err (!%p1639_p1)
}
  0x24   :  { %62 = dma.hbm_to_vmem [thread:$0]  %s2231_s3, 1024, %s57_s16, [#allocation9], %s1786_s11, %s1786_s11, %s1787_s12  }
  0x25   :  { %s1789_s26 = smov [#allocation11]   ;;  %s1790_s28 = smov [#allocation2]  }
  0x26   :  { %s78_s27 = sshll.u32 %s1789_s26, 4  ;;  %s22_s29 = sshll.u32 %s1790_s28, 4  ;;  %s79_s27 = int_to_ptr.vmem [resolvable:$true] %s78_s27  ;;  %s1863_s29 = int_to_ptr.vmem [resolvable:$true] %s22_s29 }
  0x27   :  { %s1643_s9 = scalar_lea.hbm %s2233_s5, 2048 }
  0x28   :  { %p1644_p2 = scmp.ne.s32.totalorder %s2233_s5, %s1643_s9  ;;  %p1647_p3 = scmp.lt.u32.totalorder %s1643_s9, %s2233_s5 }
  0x2a   :  { %p1649_p4 = pnand %p1647_p3, %p1644_p2 }
  0x2c   :  { %1652 = shalt.err (!%p1649_p4)
}
  0x2d   :  { %s1653_s3 = scalar_lea.vmem %s79_s27, 2048  ;;  %p1658_p6 = scmp.lt.s32.totalorder %s79_s27, %s79_s27 }
  0x2e   :  { %p1654_p5 = scmp.ne.s32.totalorder %s79_s27, %s1653_s3  ;;  %p1659_p7 = scmp.lt.s32.totalorder %s1653_s3, %s1653_s3 }
  0x30   :  { %p1660_p8 = por %p1659_p7, %p1658_p6 }
  0x32   :  { %p1661_p9 = pnand %p1660_p8, %p1654_p5 }
  0x34   :  { %1664 = shalt.err (!%p1661_p9)
}
  0x35   :  { %s1791_s11 = smov 128   ;;  %s1792_s12 = smov 8  }
  0x36   :  { %84 = dma.hbm_to_vmem [thread:$0]  %s2233_s5, 2048, %s79_s27, [#allocation12], %s1791_s11, %s1791_s11, %s1792_s12  }
  0x37   :  { %s1665_s20 = scalar_lea.hbm %s2228_s0, 4864 }
  0x38   :  { %p1666_p10 = scmp.ne.s32.totalorder %s2228_s0, %s1665_s20  ;;  %p1669_p11 = scmp.lt.u32.totalorder %s1665_s20, %s2228_s0 }
  0x3a   :  { %p1671_p12 = pnand %p1669_p11, %p1666_p10 }
  0x3c   :  { %1674 = shalt.err (!%p1671_p12)
}
  0x3d   :  { %s1675_s1 = scalar_lea.vmem %s1863_s29, 4864  ;;  %p1680_p0 = scmp.lt.s32.totalorder %s1863_s29, %s1863_s29 }
  0x3e   :  { %p1676_p13 = scmp.ne.s32.totalorder %s1863_s29, %s1675_s1  ;;  %p1681_p1 = scmp.lt.s32.totalorder %s1675_s1, %s1675_s1 }
  0x40   :  { %p1682_p2 = por %p1681_p1, %p1680_p0 }
  0x42   :  { %p1683_p3 = pnand %p1682_p2, %p1676_p13 }
  0x44   :  { %1686 = shalt.err (!%p1683_p3)
}
  0x45   :  { %28 = dma.hbm_to_vmem [thread:$0]  %s2228_s0, 4864, %s1863_s29, [#allocation3], %s1791_s11, %s1791_s11, %s1792_s12  }
  0x46   :  { %s1793_s26 = smov [#allocation7]   ;;  %s1794_s28 = smov [#allocation10]  }
  0x47   :  { %s47_s27 = sshll.u32 %s1793_s26, 4  ;;  %s69_s30 = sshll.u32 %s1794_s28, 4  ;;  %s48_s27 = int_to_ptr.vmem [resolvable:$true] %s47_s27  ;;  %s70_s30 = int_to_ptr.vmem [resolvable:$true] %s69_s30 }
  0x48   :  { %s1687_s10 = scalar_lea.hbm %s2230_s2, 16 }
  0x49   :  { %p1688_p4 = scmp.ne.s32.totalorder %s2230_s2, %s1687_s10  ;;  %p1691_p5 = scmp.lt.u32.totalorder %s1687_s10, %s2230_s2 }
  0x4b   :  { %p1693_p6 = pnand %p1691_p5, %p1688_p4 }
  0x4d   :  { %1696 = shalt.err (!%p1693_p6)
}
  0x4e   :  { %s1697_s0 = scalar_lea.vmem %s48_s27, 16  ;;  %s1701_s29 = scalar_lea.vmem %s48_s27, 32 }
  0x4f   :  { %p1698_p7 = scmp.ne.s32.totalorder %s48_s27, %s1697_s0  ;;  %p1702_p8 = scmp.lt.s32.totalorder %s48_s27, %s48_s27 }
  0x50   :  { %p1703_p9 = scmp.lt.s32.totalorder %s1701_s29, %s1697_s0 }
  0x52   :  { %p1704_p10 = por %p1703_p9, %p1702_p8 }
  0x54   :  { %p1705_p11 = pnand %p1704_p10, %p1698_p7 }
  0x56   :  { %1708 = shalt.err (!%p1705_p11)
}
  0x57   :  { %50 = dma.hbm_to_vmem [thread:$0]  %s2230_s2, 16, %s48_s27, [#allocation6]  }
  0x58   :  { %s1709_s20 = scalar_lea.hbm %s2232_s4, 16 }
  0x59   :  { %p1710_p12 = scmp.ne.s32.totalorder %s2232_s4, %s1709_s20  ;;  %p1713_p13 = scmp.lt.u32.totalorder %s1709_s20, %s2232_s4 }
  0x5b   :  { %p1715_p0 = pnand %p1713_p13, %p1710_p12 }
  0x5d   :  { %1718 = shalt.err (!%p1715_p0)
}
  0x5e   :  { %s1719_s1 = scalar_lea.vmem %s70_s30, 16  ;;  %s1723_s5 = scalar_lea.vmem %s70_s30, 32 }
  0x5f   :  { %p1720_p1 = scmp.ne.s32.totalorder %s70_s30, %s1719_s1  ;;  %p1724_p2 = scmp.lt.s32.totalorder %s70_s30, %s70_s30 }
  0x60   :  { %p1725_p3 = scmp.lt.s32.totalorder %s1723_s5, %s1719_s1 }
  0x62   :  { %p1726_p4 = por %p1725_p3, %p1724_p2 }
  0x64   :  { %p1727_p5 = pnand %p1726_p4, %p1720_p1 }
  0x66   :  { %1730 = shalt.err (!%p1727_p5)
}
  0x67   :  { %72 = dma.hbm_to_vmem [thread:$0]  %s2232_s4, 16, %s70_s30, [#allocation9]  }
  0x68   :  { %s1795_s26 = smov [#allocation13]   ;;  %s1731_s9 = scalar_lea.hbm %s2234_s6, 16 }
  0x69   :  { %s91_s27 = sshll.u32 %s1795_s26, 4  ;;  %p1732_p6 = scmp.ne.s32.totalorder %s2234_s6, %s1731_s9  ;;  %s92_s27 = int_to_ptr.vmem [resolvable:$true] %s91_s27 }
  0x6a   :  { %p1735_p7 = scmp.lt.u32.totalorder %s1731_s9, %s2234_s6 }
  0x6c   :  { %p1737_p8 = pnand %p1735_p7, %p1732_p6 }
  0x6e   :  { %1740 = shalt.err (!%p1737_p8)
}
  0x6f   :  { %s1741_s3 = scalar_lea.vmem %s92_s27, 16  ;;  %s1745_s4 = scalar_lea.vmem %s92_s27, 32 }
  0x70   :  { %p1742_p9 = scmp.ne.s32.totalorder %s92_s27, %s1741_s3  ;;  %p1746_p10 = scmp.lt.s32.totalorder %s92_s27, %s92_s27 }
  0x71   :  { %p1747_p11 = scmp.lt.s32.totalorder %s1745_s4, %s1741_s3 }
  0x73   :  { %p1748_p12 = por %p1747_p11, %p1746_p10 }
  0x75   :  { %p1749_p13 = pnand %p1748_p12, %p1742_p9 }
  0x77   :  { %1752 = shalt.err (!%p1749_p13)
}
  0x78   :  { %94 = dma.hbm_to_vmem [thread:$0]  %s2234_s6, 16, %s92_s27, [#allocation12]  }
  0x79   :  { %1775 = dma.done.wait [#allocation3], 4864  }
  0x7a   :  { %1776 = vsyncadd [#allocation3], 4294962432 }
  0x7b   :  { %1777 = dma.done.wait [#allocation6], 272  }
  0x7c   :  { %1778 = vsyncadd [#allocation6], 4294967024 }
  0x7d   :  { %1779 = dma.done.wait [#allocation9], 1040  }
  0x7e   :  { %1780 = vsyncadd [#allocation9], 4294966256 }
  0x7f   :  { %1781 = dma.done.wait [#allocation12], 2064  }
  0x80   :  { %1782 = vsyncadd [#allocation12], 4294965232  ;;  %v1796_v0 = vmov 0.0   ;;  %vm1797_vm0 = vmmov 0   ;;  %v1589_v1 = vld [vmem:[#allocation5] sm:$0xff]   ;;  %v1590_v2 = vld [vmem:[#allocation5 + $0x8] sm:$0xff]  }
  0x81   :  { %1262 = vmatprep.subr.bf16.mxu0 %v1796_v0  ;;  %1266 = vmatprep.mubr.msk.bf16.mxu0 %vm1797_vm0, %v1796_v0  ;;  %v117_v3 = vld [vmem:[#allocation2] sm:$0xff]  ;;  %v118_v4 = vld [vmem:[#allocation2 + $0x8] sm:$0xff]  ;;  %vm197_vm1 = vcmask 261120   ;;  %v119_v6 = vld [vmem:[#allocation2 + $0x10] sm:$0xff]  ;;  %vm1069_vm2 = vcmask 31744   ;;  %s1798_s6 = smov [#allocation14]  }
  0x82   :  { %1555 = vmatprep.subr.bf16.mxu1 %v1796_v0  ;;  %1326 = vmatprep.mubr.msk.bf16.mxu1 %vm1797_vm0, %v1796_v0  ;;  %v155_v5 = vpack.c.bf16 %v118_v4, %v117_v3  ;;  %v120_v7 = vld [vmem:[#allocation2 + $0x18] sm:$0xff]  ;;  %v147_v8 = vld [vmem:[#allocation2 + $0xf0] sm:$0xff]  ;;  %v149_v12 = vld [vmem:[#allocation2 + $0x100] sm:$0xff]  ;;  %s1113_s29 = sshll.u32 %s1798_s6, 4  ;;  %s1114_s29 = int_to_ptr.vmem [resolvable:$true] %s1113_s29 }
  0x83   :  { %1263 = vmatpush3.bf16.msra.mxu0 %v1589_v1  ;;  %1557 = vmatpush3.bf16.msra.mxu1 %v1589_v1  ;;  %v148_v9 = vld [vmem:[#allocation2 + $0xf8] sm:$0xff]  ;;  %v156_v10 = vpack.c.bf16 %v120_v7, %v119_v6  ;;  %v1591_v13 = vld [vmem:[#allocation8] sm:$0xff]   ;;  %v1592_v16 = vld [vmem:[#allocation8 + $0x8] sm:$0xff]   ;;  %s1753_s16 = scalar_lea.vmem %s1114_s29, 4864  ;;  %p1758_p1 = scmp.lt.s32.totalorder %s1114_s29, %s1114_s29 }
  0x84   :  { %1264 = vmatprep.subr.bf16.mxu0 %v1796_v0  ;;  %1556 = vmatprep.subr.bf16.mxu1 %v1796_v0  ;;  %v170_v11 = vpack.c.bf16 %v148_v9, %v147_v8  ;;  %v121_v14 = vld [vmem:[#allocation2 + $0x20] sm:$0xff]  ;;  %v150_v15 = vld [vmem:[#allocation2 + $0x108] sm:$0xff]  ;;  %v1593_v19 = vld [vmem:[#allocation8 + $0x10] sm:$0xff]   ;;  %p1754_p0 = scmp.ne.s32.totalorder %s1114_s29, %s1753_s16  ;;  %p1759_p2 = scmp.lt.s32.totalorder %s1753_s16, %s1753_s16 }
  0x85   :  { %v122_v17 = vld [vmem:[#allocation2 + $0x28] sm:$0xff]  ;;  %v171_v18 = vpack.c.bf16 %v150_v15, %v149_v12  ;;  %v151_v21 = vld [vmem:[#allocation2 + $0x110] sm:$0xff]  ;;  %v152_v22 = vld [vmem:[#allocation2 + $0x118] sm:$0xff] }
  0x86   :  { %v157_v20 = vpack.c.bf16 %v122_v17, %v121_v14  ;;  %v1594_v23 = vld [vmem:[#allocation8 + $0x18] sm:$0xff]   ;;  %v123_v24 = vld [vmem:[#allocation2 + $0x30] sm:$0xff]  ;;  %v172_v26 = vpack.c.bf16 %v152_v22, %v151_v21  ;;  %v1595_v28 = vld [vmem:[#allocation8 + $0x20] sm:$0xff]   ;;  %p1760_p3 = por %p1759_p2, %p1758_p1 }
  0x87   :  { %1265 = vmatpush3.bf16.msra.mxu0 %v1590_v2  ;;  %1558 = vmatpush3.bf16.msra.mxu1 %v1590_v2  ;;  %v124_v25 = vld [vmem:[#allocation2 + $0x38] sm:$0xff]  ;;  %v153_v29 = vld [vmem:[#allocation2 + $0x120] sm:$0xff]  ;;  %v154_v30 = vld [vmem:[#allocation2 + $0x128] sm:$0xff] }
  0x88   :  { %1342 = vmatprep.subr.bf16.mxu1 %v1796_v0  ;;  %v158_v27 = vpack.c.bf16 %v124_v25, %v123_v24  ;;  %v1596_v31 = vld [vmem:[#allocation8 + $0x28] sm:$0xff]   ;;  %v125_v32 = vld [vmem:[#allocation2 + $0x40] sm:$0xff]  ;;  %v173_v34 = vpack.c.bf16 %v154_v30, %v153_v29  ;;  %v128_v37 = vld [vmem:[#allocation2 + $0x58] sm:$0xff]  ;;  %p1761_p4 = pnand %p1760_p3, %p1754_p0 }
  0x89   :  { %v126_v33 = vld [vmem:[#allocation2 + $0x48] sm:$0xff]  ;;  %v127_v36 = vld [vmem:[#allocation2 + $0x50] sm:$0xff]  ;;  %v129_v39 = vld [vmem:[#allocation2 + $0x60] sm:$0xff] }
  0x8a   :  { %1267 = vmatmul.mubr.msk.bf16.vlgmr.msra.gmra.mrb[0].mxu0 %vm197_vm1, %v155_v5  ;;  %1327 = vmatmul.mubr.msk.bf16.vlgmr.msra.gmra.mrb[0].mxu1 %vm197_vm1, %v170_v11  ;;  %v159_v35 = vpack.c.bf16 %v126_v33, %v125_v32  ;;  %v160_v38 = vpack.c.bf16 %v128_v37, %v127_v36  ;;  %v130_v40 = vld [vmem:[#allocation2 + $0x68] sm:$0xff]  ;;  %v131_v42 = vld [vmem:[#allocation2 + $0x70] sm:$0xff]  ;;  %v132_v43 = vld [vmem:[#allocation2 + $0x78] sm:$0xff] }
  0x8b   :  { %1270 = vmatprep.mubr.msk.bf16.mxu0 %vm1797_vm0, %v1796_v0  ;;  %1330 = vmatprep.mubr.msk.bf16.mxu1 %vm1797_vm0, %v1796_v0  ;;  %v161_v41 = vpack.c.bf16 %v130_v40, %v129_v39  ;;  %v162_v44 = vpack.c.bf16 %v132_v43, %v131_v42  ;;  %v133_v45 = vld [vmem:[#allocation2 + $0x80] sm:$0xff]  ;;  %v134_v46 = vld [vmem:[#allocation2 + $0x88] sm:$0xff]  ;;  %v135_v48 = vld [vmem:[#allocation2 + $0x90] sm:$0xff] }
  0x8c   :  { %1343 = vmatpush3.bf16.msra.mxu1 %v1591_v13  ;;  %v163_v47 = vpack.c.bf16 %v134_v46, %v133_v45  ;;  %v136_v49 = vld [vmem:[#allocation2 + $0x98] sm:$0xff]  ;;  %v137_v51 = vld [vmem:[#allocation2 + $0xa0] sm:$0xff]  ;;  %v138_v52 = vld [vmem:[#allocation2 + $0xa8] sm:$0xff] }
  0x8d   :  { %1344 = vmatprep.subr.bf16.mxu1 %v1796_v0  ;;  %v164_v50 = vpack.c.bf16 %v136_v49, %v135_v48  ;;  %v165_v53 = vpack.c.bf16 %v138_v52, %v137_v51  ;;  %v139_v54 = vld [vmem:[#allocation2 + $0xb0] sm:$0xff]  ;;  %v140_v55 = vld [vmem:[#allocation2 + $0xb8] sm:$0xff]  ;;  %v141_v59 = vld [vmem:[#allocation2 + $0xc0] sm:$0xff] }
  0x8e   :  { %v1597_v56 = vld [vmem:[#allocation8 + $0x30] sm:$0xff]   ;;  %v166_v57 = vpack.c.bf16 %v140_v55, %v139_v54  ;;  %v1598_v58 = vld [vmem:[#allocation8 + $0x38] sm:$0xff]   ;;  %v142_v60 = vld [vmem:[#allocation2 + $0xc8] sm:$0xff] }
  0x8f   :  { %v167_v61 = vpack.c.bf16 %v142_v60, %v141_v59  ;;  %v143_v62 = vld [vmem:[#allocation2 + $0xd0] sm:$0xff]  ;;  %v144_v63 = vld [vmem:[#allocation2 + $0xd8] sm:$0xff]  ;;  %v145_v2 = vld [vmem:[#allocation2 + $0xe0] sm:$0xff] }
  0x90   :  { %1345 = vmatpush3.bf16.msra.mxu1 %v1592_v16  ;;  %v168_v1 = vpack.c.bf16 %v144_v63, %v143_v62  ;;  %v146_v3 = vld [vmem:[#allocation2 + $0xe8] sm:$0xff]  ;;  %v2007_v5 = vld [vmem:[#allocation7] ss:$0 sm:$0xff]  ;;  %v793_v63 = vld [vmem:[#allocation11 + $0x10] sm:$0xff] }
  0x91   :  { %1346 = vmatprep.subr.bf16.mxu1 %v1796_v0  ;;  %v169_v4 = vpack.c.bf16 %v146_v3, %v145_v2  ;;  %v792_v62 = vld [vmem:[#allocation11 + $0x8] sm:$0xff]  ;;  %v794_v3 = vld [vmem:[#allocation11 + $0x18] sm:$0xff] }
  0x92   :  { %1271 = vmatmul.mubr.msk.bf16.gmra.mrb[4].mxu0 %vm197_vm1, %v156_v10  ;;  %1331 = vmatmul.mubr.msk.bf16.gmra.mrb[4].mxu1 %vm197_vm1, %v171_v18 }
  0x93   :  { %1274 = vmatprep.mubr.msk.bf16.mxu0 %vm1797_vm0, %v1796_v0  ;;  %1334 = vmatprep.mubr.msk.bf16.mxu1 %vm1797_vm0, %v1796_v0 }
  0x94   :  { %1347 = vmatpush3.bf16.msra.mxu1 %v1593_v19 }
  0x95   :  { %1348 = vmatprep.subr.bf16.mxu1 %v1796_v0 }
  0x98   :  { %1349 = vmatpush3.bf16.msra.mxu1 %v1594_v23 }
  0x99   :  { %1350 = vmatprep.subr.bf16.mxu1 %v1796_v0 }
  0x9a   :  { %1275 = vmatmul.mubr.msk.bf16.gmra.mrb[8].mxu0 %vm197_vm1, %v157_v20  ;;  %1335 = vmatmul.mubr.msk.bf16.gmra.mrb[8].mxu1 %vm197_vm1, %v172_v26 }
  0x9b   :  { %1278 = vmatprep.mubr.msk.bf16.mxu0 %vm1797_vm0, %v1796_v0  ;;  %1338 = vmatprep.mubr.msk.bf16.mxu1 %vm1797_vm0, %v1796_v0 }
  0x9c   :  { %1351 = vmatpush3.bf16.msra.mxu1 %v1595_v28 }
  0x9d   :  { %1352 = vmatprep.subr.bf16.mxu1 %v1796_v0 }
  0xa0   :  { %1353 = vmatpush3.bf16.msra.mxu1 %v1596_v31 }
  0xa1   :  { %1354 = vmatprep.subr.bf16.mxu1 %v1796_v0 }
  0xa2   :  { %1279 = vmatmul.mubr.msk.bf16.gmra.mrb[12].mxu0 %vm197_vm1, %v158_v27  ;;  %1339 = vmatmul.mubr.msk.bf16.gmra.mrb[12].mxu1 %vm197_vm1, %v173_v34 }
  0xa3   :  { %1282 = vmatprep.mubr.msk.bf16.mxu0 %vm1797_vm0, %v1796_v0  ;;  %1358 = vmatprep.mubr.msk.bf16.mxu1 %vm1797_vm0, %v1796_v0 }
  0xa4   :  { %1355 = vmatpush3.bf16.msra.mxu1 %v1597_v56 }
  0xa5   :  { %1356 = vmatprep.subr.bf16.mxu1 %v1796_v0 }
  0xa8   :  { %1357 = vmatpush3.bf16.msra.mxu1 %v1598_v58 }
  0xaa   :  { %1283 = vmatmul.mubr.msk.bf16.gmra.mrb[16].mxu0 %vm197_vm1, %v159_v35 }
  0xab   :  { %1286 = vmatprep.mubr.msk.bf16.mxu0 %vm1797_vm0, %v1796_v0 }
  0xb2   :  { %1287 = vmatmul.mubr.msk.bf16.gmra.mrb[20].mxu0 %vm197_vm1, %v160_v38 }
  0xb3   :  { %1290 = vmatprep.mubr.msk.bf16.mxu0 %vm1797_vm0, %v1796_v0 }
  0xba   :  { %1291 = vmatmul.mubr.msk.bf16.gmra.mrb[24].mxu0 %vm197_vm1, %v161_v41 }
  0xbb   :  { %1294 = vmatprep.mubr.msk.bf16.mxu0 %vm1797_vm0, %v1796_v0 }
  0xc2   :  { %1295 = vmatmul.mubr.msk.bf16.gmra.mrb[28].mxu0 %vm197_vm1, %v162_v44 }
  0xc3   :  { %1298 = vmatprep.mubr.msk.bf16.mxu0 %vm1797_vm0, %v1796_v0 }
  0xca   :  { %1299 = vmatmul.mubr.msk.bf16.gmra.mrb[32].mxu0 %vm197_vm1, %v163_v47 }
  0xcb   :  { %1302 = vmatprep.mubr.msk.bf16.mxu0 %vm1797_vm0, %v1796_v0 }
  0xd2   :  { %1303 = vmatmul.mubr.msk.bf16.gmra.mrb[36].mxu0 %vm197_vm1, %v164_v50 }
  0xd3   :  { %1306 = vmatprep.mubr.msk.bf16.mxu0 %vm1797_vm0, %v1796_v0 }
  0xda   :  { %1307 = vmatmul.mubr.msk.bf16.gmra.mrb[40].mxu0 %vm197_vm1, %v165_v53 }
  0xdb   :  { %1310 = vmatprep.mubr.msk.bf16.mxu0 %vm1797_vm0, %v1796_v0 }
  0xe2   :  { %1311 = vmatmul.mubr.msk.bf16.gmra.mrb[44].mxu0 %vm197_vm1, %v166_v57 }
  0xe3   :  { %1314 = vmatprep.mubr.msk.bf16.mxu0 %vm1797_vm0, %v1796_v0 }
  0xea   :  { %1315 = vmatmul.mubr.msk.bf16.gmra.mrb[48].mxu0 %vm197_vm1, %v167_v61  ;;  %v791_v61 = vld [vmem:[#allocation11] sm:$0xff] }
  0xeb   :  { %1318 = vmatprep.mubr.msk.bf16.mxu0 %vm1797_vm0, %v1796_v0  ;;  %v1523_v2 = vpack.c.bf16 %v792_v62, %v791_v61 }
  0xed   :  { %1524 = vmatprep.subr.bf16.mxu0 %v1523_v2  ;;  %1559 = vmatprep.subr.bf16.mxu1 %v1523_v2 }
  0xee   :  { %1526 = vmatpush3.bf16.msra.mxu0 %v1523_v2 }
  0xf2   :  { %1319 = vmatmul.mubr.msk.bf16.gmra.mrb[52].mxu0 %vm197_vm1, %v168_v1 }
  0xf3   :  { %1322 = vmatprep.mubr.msk.bf16.mxu0 %vm1797_vm0, %v1796_v0 }
  0xfa   :  { %1323 = vmatmul.mubr.msk.bf16.gmra.mrb[56].mxu0 %vm197_vm1, %v169_v4 }
 0x15d   :  { %v289_v6 = vpop.f32.mrb[0].mxu0  ;;  %v409_v14 = vpop.f32.mrb[0].mxu1 }
 0x15e   :  { %v290_v7 = vadd.f32 %v2007_v5, %v289_v6  ;;  %v1268_v8 = vpop.f32.mrb[1].mxu0  ;;  %v410_v16 = vadd.f32 %v2007_v5, %v409_v14  ;;  %v1328_v17 = vpop.f32.mrb[1].mxu1 }
 0x15f   :  { %v292_v9 = vpop.f32.mrb[2].mxu0  ;;  %v412_v19 = vpop.f32.mrb[2].mxu1  ;;  %v1527_v8 = vpack.c.bf16 %v794_v3, %v793_v63 }
 0x160   :  { %v293_v10 = vadd.f32 %v2007_v5, %v292_v9  ;;  %v1269_v11 = vpop.f32.mrb[3].mxu0  ;;  %v440_v12 = vmax.f32 %v290_v7, 0.0  ;;  %v470_v22 = vmax.f32 %v410_v16, 0.0  ;;  %v413_v23 = vadd.f32 %v2007_v5, %v412_v19  ;;  %v1329_v24 = vpop.f32.mrb[3].mxu1  ;;  %v795_v9 = vld [vmem:[#allocation11 + $0x20] sm:$0xff]  ;;  %v797_v19 = vld [vmem:[#allocation11 + $0x30] sm:$0xff] }
 0x161   :  { %1528 = vmatprep.subr.bf16.mxu0 %v1527_v8 }
 0x162   :  { %v441_v13 = vmax.f32 %v293_v10, 0.0  ;;  %v471_v28 = vmax.f32 %v413_v23, 0.0  ;;  %v796_v10 = vld [vmem:[#allocation11 + $0x28] sm:$0xff]  ;;  %1530 = vmatpush3.bf16.msra.mxu0 %v1527_v8 }
 0x164   :  { %v478_v15 = vpack.c.bf16 %v441_v13, %v440_v12  ;;  %v2017_v31 = vpack.c.bf16 %v471_v28, %v470_v22 }
 0x165   :  { %v297_v18 = vpop.f32.mrb[4].mxu0  ;;  %v417_v32 = vpop.f32.mrb[4].mxu1 }
 0x166   :  { %v298_v20 = vadd.f32 %v2007_v5, %v297_v18  ;;  %v1272_v21 = vpop.f32.mrb[5].mxu0  ;;  %1359 = vmatmul.mubr.bf16.vlgmr.msra.gmra.mrb[16].mxu1 %v478_v15  ;;  %v418_v34 = vadd.f32 %v2007_v5, %v417_v32  ;;  %v1332_v35 = vpop.f32.mrb[5].mxu1  ;;  %v1531_v15 = vpack.c.bf16 %v796_v10, %v795_v9 }
 0x167   :  { %v300_v25 = vpop.f32.mrb[6].mxu0  ;;  %1362 = vmatprep.mubr.msk.bf16.mxu1 %vm1797_vm0, %v1796_v0  ;;  %v420_v37 = vpop.f32.mrb[6].mxu1  ;;  %1567 = vmatpush3.bf16.msra.mxu1 %v1523_v2  ;;  %v800_v35 = vld [vmem:[#allocation11 + $0x48] sm:$0xff] }
 0x168   :  { %v301_v26 = vadd.f32 %v2007_v5, %v300_v25  ;;  %v1273_v27 = vpop.f32.mrb[7].mxu0  ;;  %v442_v29 = vmax.f32 %v298_v20, 0.0  ;;  %v472_v40 = vmax.f32 %v418_v34, 0.0  ;;  %v421_v41 = vadd.f32 %v2007_v5, %v420_v37  ;;  %v1333_v42 = vpop.f32.mrb[7].mxu1  ;;  %1560 = vmatprep.subr.bf16.mxu1 %v1527_v8  ;;  %v798_v20 = vld [vmem:[#allocation11 + $0x38] sm:$0xff]  ;;  %1532 = vmatprep.subr.bf16.mxu0 %v1531_v15  ;;  %v799_v34 = vld [vmem:[#allocation11 + $0x40] sm:$0xff] }
 0x169   :  { %1534 = vmatpush3.bf16.msra.mxu0 %v1531_v15  ;;  %v802_v42 = vld [vmem:[#allocation11 + $0x58] sm:$0xff] }
 0x16a   :  { %v443_v30 = vmax.f32 %v301_v26, 0.0  ;;  %v473_v46 = vmax.f32 %v421_v41, 0.0  ;;  %v801_v41 = vld [vmem:[#allocation11 + $0x50] sm:$0xff] }
 0x16b   :  { %1568 = vmatpush3.bf16.msra.mxu1 %v1527_v8 }
 0x16c   :  { %v479_v33 = vpack.c.bf16 %v443_v30, %v442_v29  ;;  %v2025_v49 = vpack.c.bf16 %v473_v46, %v472_v40  ;;  %v1535_v29 = vpack.c.bf16 %v798_v20, %v797_v19  ;;  %1561 = vmatprep.subr.bf16.mxu1 %v1531_v15 }
 0x16d   :  { %v305_v36 = vpop.f32.mrb[8].mxu0  ;;  %v425_v50 = vpop.f32.mrb[8].mxu1 }
 0x16e   :  { %v306_v38 = vadd.f32 %v2007_v5, %v305_v36  ;;  %v1276_v39 = vpop.f32.mrb[9].mxu0  ;;  %1363 = vmatmul.mubr.bf16.gmra.mrb[20].mxu1 %v479_v33  ;;  %v426_v52 = vadd.f32 %v2007_v5, %v425_v50  ;;  %v1336_v53 = vpop.f32.mrb[9].mxu1  ;;  %1536 = vmatprep.subr.bf16.mxu0 %v1535_v29 }
 0x16f   :  { %v308_v43 = vpop.f32.mrb[10].mxu0  ;;  %1366 = vmatprep.mubr.msk.bf16.mxu1 %vm1797_vm0, %v1796_v0  ;;  %v428_v55 = vpop.f32.mrb[10].mxu1  ;;  %v1539_v39 = vpack.c.bf16 %v800_v35, %v799_v34  ;;  %1569 = vmatpush3.bf16.msra.mxu1 %v1531_v15 }
 0x170   :  { %v309_v44 = vadd.f32 %v2007_v5, %v308_v43  ;;  %v1277_v45 = vpop.f32.mrb[11].mxu0  ;;  %v444_v47 = vmax.f32 %v306_v38, 0.0  ;;  %v474_v58 = vmax.f32 %v426_v52, 0.0  ;;  %v429_v59 = vadd.f32 %v2007_v5, %v428_v55  ;;  %v1337_v60 = vpop.f32.mrb[11].mxu1  ;;  %1562 = vmatprep.subr.bf16.mxu1 %v1535_v29  ;;  %1538 = vmatpush3.bf16.msra.mxu0 %v1535_v29  ;;  %v804_v52 = vld [vmem:[#allocation11 + $0x68] sm:$0xff] }
 0x171   :  { %1540 = vmatprep.subr.bf16.mxu0 %v1539_v39 }
 0x172   :  { %v445_v48 = vmax.f32 %v309_v44, 0.0  ;;  %v475_v7 = vmax.f32 %v429_v59, 0.0 }
 0x173   :  { %1570 = vmatpush3.bf16.msra.mxu1 %v1535_v29 }
 0x174   :  { %v480_v51 = vpack.c.bf16 %v445_v48, %v444_v47  ;;  %v2033_v13 = vpack.c.bf16 %v475_v7, %v474_v58  ;;  %v1543_v47 = vpack.c.bf16 %v802_v42, %v801_v41  ;;  %1563 = vmatprep.subr.bf16.mxu1 %v1539_v39  ;;  %1542 = vmatpush3.bf16.msra.mxu0 %v1539_v39 }
 0x175   :  { %v313_v54 = vpop.f32.mrb[12].mxu0  ;;  %v433_v14 = vpop.f32.mrb[12].mxu1 }
 0x176   :  { %v314_v56 = vadd.f32 %v2007_v5, %v313_v54  ;;  %v1280_v57 = vpop.f32.mrb[13].mxu0  ;;  %1367 = vmatmul.mubr.bf16.gmra.mrb[24].mxu1 %v480_v51  ;;  %v434_v17 = vadd.f32 %v2007_v5, %v433_v14  ;;  %v1340_v18 = vpop.f32.mrb[13].mxu1  ;;  %v803_v51 = vld [vmem:[#allocation11 + $0x60] sm:$0xff]  ;;  %1544 = vmatprep.subr.bf16.mxu0 %v1543_v47 }
 0x177   :  { %v316_v1 = vpop.f32.mrb[14].mxu0  ;;  %1370 = vmatprep.mubr.msk.bf16.mxu1 %vm1797_vm0, %v1796_v0  ;;  %v436_v22 = vpop.f32.mrb[14].mxu1  ;;  %v1547_v55 = vpack.c.bf16 %v804_v52, %v803_v51  ;;  %1571 = vmatpush3.bf16.msra.mxu1 %v1539_v39  ;;  %v806_v51 = vld [vmem:[#allocation11 + $0x78] sm:$0xff] }
 0x178   :  { %v317_v4 = vadd.f32 %v2007_v5, %v316_v1  ;;  %v1281_v6 = vpop.f32.mrb[15].mxu0  ;;  %v446_v11 = vmax.f32 %v314_v56, 0.0  ;;  %v476_v25 = vmax.f32 %v434_v17, 0.0  ;;  %v437_v26 = vadd.f32 %v2007_v5, %v436_v22  ;;  %v1341_v27 = vpop.f32.mrb[15].mxu1  ;;  %1564 = vmatprep.subr.bf16.mxu1 %v1543_v47  ;;  %1546 = vmatpush3.bf16.msra.mxu0 %v1543_v47 }
 0x179   :  { %1548 = vmatprep.subr.bf16.mxu0 %v1547_v55 }
 0x17a   :  { %v447_v12 = vmax.f32 %v317_v4, 0.0  ;;  %v477_v33 = vmax.f32 %v437_v26, 0.0 }
 0x17b   :  { %1572 = vmatpush3.bf16.msra.mxu1 %v1543_v47 }
 0x17c   :  { %v481_v16 = vpack.c.bf16 %v447_v12, %v446_v11  ;;  %v2041_v38 = vpack.c.bf16 %v477_v33, %v476_v25  ;;  %1565 = vmatprep.subr.bf16.mxu1 %v1547_v55  ;;  %1550 = vmatpush3.bf16.msra.mxu0 %v1547_v55 }
 0x17d   :  { %v321_v21 = vpop.f32.mrb[16].mxu0 }
 0x17e   :  { %v322_v23 = vadd.f32 %v2007_v5, %v321_v21  ;;  %v1284_v24 = vpop.f32.mrb[17].mxu0  ;;  %1371 = vmatmul.mubr.bf16.gmra.mrb[28].mxu1 %v481_v16 }
 0x17f   :  { %v324_v28 = vpop.f32.mrb[18].mxu0  ;;  %1374 = vmatprep.mubr.msk.bf16.mxu1 %vm1797_vm0, %v1796_v0  ;;  %1573 = vmatpush3.bf16.msra.mxu1 %v1547_v55 }
 0x180   :  { %v325_v30 = vadd.f32 %v2007_v5, %v324_v28  ;;  %v1285_v32 = vpop.f32.mrb[19].mxu0  ;;  %v448_v36 = vmax.f32 %v322_v23, 0.0 }
 0x182   :  { %v449_v37 = vmax.f32 %v325_v30, 0.0 }
 0x184   :  { %v482_v40 = vpack.c.bf16 %v449_v37, %v448_v36 }
 0x185   :  { %v329_v43 = vpop.f32.mrb[20].mxu0 }
 0x186   :  { %v330_v44 = vadd.f32 %v2007_v5, %v329_v43  ;;  %v1288_v45 = vpop.f32.mrb[21].mxu0  ;;  %1375 = vmatmul.mubr.bf16.gmra.mrb[32].mxu1 %v482_v40 }
 0x187   :  { %v332_v46 = vpop.f32.mrb[22].mxu0  ;;  %1378 = vmatprep.mubr.msk.bf16.mxu1 %vm1797_vm0, %v1796_v0 }
 0x188   :  { %v333_v48 = vadd.f32 %v2007_v5, %v332_v46  ;;  %v1289_v50 = vpop.f32.mrb[23].mxu0  ;;  %v450_v53 = vmax.f32 %v330_v44, 0.0 }
 0x189   :  { %v805_v50 = vld [vmem:[#allocation11 + $0x70] sm:$0xff] }
 0x18a   :  { %v451_v54 = vmax.f32 %v333_v48, 0.0 }
 0x18c   :  { %v483_v56 = vpack.c.bf16 %v451_v54, %v450_v53  ;;  %v1551_v54 = vpack.c.bf16 %v806_v51, %v805_v50 }
 0x18d   :  { %v337_v57 = vpop.f32.mrb[24].mxu0 }
 0x18e   :  { %v338_v58 = vadd.f32 %v2007_v5, %v337_v57  ;;  %v1292_v59 = vpop.f32.mrb[25].mxu0  ;;  %1379 = vmatmul.mubr.bf16.gmra.mrb[36].mxu1 %v483_v56  ;;  %1552 = vmatprep.subr.bf16.mxu0 %v1551_v54 }
 0x18f   :  { %v340_v60 = vpop.f32.mrb[26].mxu0  ;;  %1382 = vmatprep.mubr.msk.bf16.mxu1 %vm1797_vm0, %v1796_v0  ;;  %1566 = vmatprep.subr.bf16.mxu1 %v1551_v54 }
 0x190   :  { %v341_v61 = vadd.f32 %v2007_v5, %v340_v60  ;;  %v1293_v62 = vpop.f32.mrb[27].mxu0  ;;  %v452_v63 = vmax.f32 %v338_v58, 0.0  ;;  %1554 = vmatpush3.bf16.msra.mxu0 %v1551_v54  ;;  %1574 = vmatpush3.bf16.msra.mxu1 %v1551_v54 }
 0x192   :  { %v453_v1 = vmax.f32 %v341_v61, 0.0 }
 0x194   :  { %v484_v2 = vpack.c.bf16 %v453_v1, %v452_v63 }
 0x195   :  { %v345_v3 = vpop.f32.mrb[28].mxu0 }
 0x196   :  { %v346_v4 = vadd.f32 %v2007_v5, %v345_v3  ;;  %v1296_v6 = vpop.f32.mrb[29].mxu0  ;;  %1383 = vmatmul.mubr.bf16.gmra.mrb[40].mxu1 %v484_v2 }
 0x197   :  { %v348_v7 = vpop.f32.mrb[30].mxu0  ;;  %1386 = vmatprep.mubr.msk.bf16.mxu1 %vm1797_vm0, %v1796_v0 }
 0x198   :  { %v349_v8 = vadd.f32 %v2007_v5, %v348_v7  ;;  %v1297_v9 = vpop.f32.mrb[31].mxu0  ;;  %v454_v10 = vmax.f32 %v346_v4, 0.0 }
 0x19a   :  { %v455_v11 = vmax.f32 %v349_v8, 0.0 }
 0x19c   :  { %v485_v12 = vpack.c.bf16 %v455_v11, %v454_v10 }
 0x19d   :  { %v353_v14 = vpop.f32.mrb[32].mxu0 }
 0x19e   :  { %v354_v15 = vadd.f32 %v2007_v5, %v353_v14  ;;  %v1300_v16 = vpop.f32.mrb[33].mxu0  ;;  %1387 = vmatmul.mubr.bf16.gmra.mrb[44].mxu1 %v485_v12 }
 0x19f   :  { %v356_v17 = vpop.f32.mrb[34].mxu0  ;;  %1390 = vmatprep.mubr.msk.bf16.mxu1 %vm1797_vm0, %v1796_v0 }
 0x1a0   :  { %v357_v18 = vadd.f32 %v2007_v5, %v356_v17  ;;  %v1301_v19 = vpop.f32.mrb[35].mxu0  ;;  %v456_v20 = vmax.f32 %v354_v15, 0.0 }
 0x1a2   :  { %v457_v21 = vmax.f32 %v357_v18, 0.0 }
 0x1a4   :  { %v486_v22 = vpack.c.bf16 %v457_v21, %v456_v20 }
 0x1a5   :  { %v361_v23 = vpop.f32.mrb[36].mxu0 }
 0x1a6   :  { %v362_v24 = vadd.f32 %v2007_v5, %v361_v23  ;;  %v1304_v25 = vpop.f32.mrb[37].mxu0  ;;  %1391 = vmatmul.mubr.bf16.gmra.mrb[48].mxu1 %v486_v22 }
 0x1a7   :  { %v364_v26 = vpop.f32.mrb[38].mxu0  ;;  %1394 = vmatprep.mubr.msk.bf16.mxu1 %vm1797_vm0, %v1796_v0 }
 0x1a8   :  { %v365_v27 = vadd.f32 %v2007_v5, %v364_v26  ;;  %v1305_v28 = vpop.f32.mrb[39].mxu0  ;;  %v458_v29 = vmax.f32 %v362_v24, 0.0 }
 0x1aa   :  { %v459_v30 = vmax.f32 %v365_v27, 0.0 }
 0x1ac   :  { %v487_v32 = vpack.c.bf16 %v459_v30, %v458_v29 }
 0x1ad   :  { %v369_v33 = vpop.f32.mrb[40].mxu0 }
 0x1ae   :  { %v370_v34 = vadd.f32 %v2007_v5, %v369_v33  ;;  %v1308_v35 = vpop.f32.mrb[41].mxu0  ;;  %1395 = vmatmul.mubr.bf16.gmra.mrb[52].mxu1 %v487_v32 }
 0x1af   :  { %v372_v36 = vpop.f32.mrb[42].mxu0  ;;  %1398 = vmatprep.mubr.msk.bf16.mxu1 %vm1797_vm0, %v1796_v0 }
 0x1b0   :  { %v373_v37 = vadd.f32 %v2007_v5, %v372_v36  ;;  %v1309_v39 = vpop.f32.mrb[43].mxu0  ;;  %v460_v40 = vmax.f32 %v370_v34, 0.0 }
 0x1b2   :  { %v461_v41 = vmax.f32 %v373_v37, 0.0 }
 0x1b4   :  { %v488_v42 = vpack.c.bf16 %v461_v41, %v460_v40 }
 0x1b5   :  { %v377_v43 = vpop.f32.mrb[44].mxu0 }
 0x1b6   :  { %v378_v44 = vadd.f32 %v2007_v5, %v377_v43  ;;  %v1312_v45 = vpop.f32.mrb[45].mxu0  ;;  %1399 = vmatmul.mubr.bf16.gmra.mrb[56].mxu1 %v488_v42 }
 0x1b7   :  { %v380_v46 = vpop.f32.mrb[46].mxu0  ;;  %1402 = vmatprep.mubr.msk.bf16.mxu1 %vm1797_vm0, %v1796_v0 }
 0x1b8   :  { %v381_v47 = vadd.f32 %v2007_v5, %v380_v46  ;;  %v1313_v48 = vpop.f32.mrb[47].mxu0  ;;  %v462_v52 = vmax.f32 %v378_v44, 0.0 }
 0x1ba   :  { %v463_v53 = vmax.f32 %v381_v47, 0.0 }
 0x1bc   :  { %v489_v55 = vpack.c.bf16 %v463_v53, %v462_v52 }
 0x1bd   :  { %v385_v56 = vpop.f32.mrb[48].mxu0 }
 0x1be   :  { %v386_v57 = vadd.f32 %v2007_v5, %v385_v56  ;;  %v1316_v58 = vpop.f32.mrb[49].mxu0  ;;  %1403 = vmatmul.mubr.bf16.gmra.mrb[60].mxu1 %v489_v55 }
 0x1bf   :  { %v388_v59 = vpop.f32.mrb[50].mxu0  ;;  %1406 = vmatprep.mubr.msk.bf16.mxu1 %vm1797_vm0, %v1796_v0 }
 0x1c0   :  { %v389_v60 = vadd.f32 %v2007_v5, %v388_v59  ;;  %v1317_v61 = vpop.f32.mrb[51].mxu0  ;;  %v464_v62 = vmax.f32 %v386_v57, 0.0 }
 0x1c2   :  { %v465_v63 = vmax.f32 %v389_v60, 0.0 }
 0x1c4   :  { %v490_v1 = vpack.c.bf16 %v465_v63, %v464_v62 }
 0x1c5   :  { %v393_v2 = vpop.f32.mrb[52].mxu0 }
 0x1c6   :  { %v394_v3 = vadd.f32 %v2007_v5, %v393_v2  ;;  %v1320_v4 = vpop.f32.mrb[53].mxu0  ;;  %1407 = vmatmul.mubr.bf16.gmra.mrb[64].mxu1 %v490_v1 }
 0x1c7   :  { %v396_v6 = vpop.f32.mrb[54].mxu0  ;;  %1410 = vmatprep.mubr.msk.bf16.mxu1 %vm1797_vm0, %v1796_v0 }
 0x1c8   :  { %v397_v7 = vadd.f32 %v2007_v5, %v396_v6  ;;  %v1321_v8 = vpop.f32.mrb[55].mxu0  ;;  %v466_v9 = vmax.f32 %v394_v3, 0.0 }
 0x1ca   :  { %v467_v10 = vmax.f32 %v397_v7, 0.0 }
 0x1cc   :  { %v491_v11 = vpack.c.bf16 %v467_v10, %v466_v9 }
 0x1cd   :  { %v401_v12 = vpop.f32.mrb[56].mxu0 }
 0x1ce   :  { %v402_v14 = vadd.f32 %v2007_v5, %v401_v12  ;;  %v1324_v15 = vpop.f32.mrb[57].mxu0  ;;  %1411 = vmatmul.mubr.bf16.gmra.mrb[68].mxu1 %v491_v11 }
 0x1cf   :  { %v404_v16 = vpop.f32.mrb[58].mxu0  ;;  %1414 = vmatprep.mubr.msk.bf16.mxu1 %vm1797_vm0, %v1796_v0 }
 0x1d0   :  { %v405_v17 = vadd.f32 %v2007_v5, %v404_v16  ;;  %v1325_v18 = vpop.f32.mrb[59].mxu0  ;;  %v468_v19 = vmax.f32 %v402_v14, 0.0  ;;  %v2095_v5 = vld [vmem:[#allocation10] ss:$0 sm:$0xff] }
 0x1d2   :  { %v469_v20 = vmax.f32 %v405_v17, 0.0 }
 0x1d4   :  { %v492_v21 = vpack.c.bf16 %v469_v20, %v468_v19 }
 0x1d6   :  { %1415 = vmatmul.mubr.bf16.gmra.mrb[72].mxu1 %v492_v21 }
 0x1d7   :  { %1418 = vmatprep.mubr.msk.bf16.mxu1 %vm1797_vm0, %v1796_v0 }
 0x1de   :  { %1419 = vmatmul.mubr.bf16.gmra.mrb[76].mxu1 %v2017_v31 }
 0x1df   :  { %1422 = vmatprep.mubr.msk.bf16.mxu1 %vm1797_vm0, %v1796_v0 }
 0x1e6   :  { %1423 = vmatmul.mubr.bf16.gmra.mrb[80].mxu1 %v2025_v49 }
 0x1e7   :  { %1426 = vmatprep.mubr.msk.bf16.mxu1 %vm1797_vm0, %v1796_v0 }
 0x1ee   :  { %1427 = vmatmul.mubr.bf16.gmra.mrb[84].mxu1 %v2033_v13 }
 0x1ef   :  { %1430 = vmatprep.mubr.msk.bf16.mxu1 %vm1797_vm0, %v1796_v0 }
 0x1f6   :  { %1431 = vmatmul.mubr.bf16.gmra.mrb[88].mxu1 %v2041_v38 }
 0x239   :  { %v602_v22 = vpop.f32.mrb[16].mxu1 }
 0x23a   :  { %v603_v31 = vadd.f32 %v2095_v5, %v602_v22  ;;  %v1360_v23 = vpop.f32.mrb[17].mxu1 }
 0x23b   :  { %v605_v24 = vpop.f32.mrb[18].mxu1 }
 0x23c   :  { %v753_v25 = vmax.f32 %v603_v31, 0.0  ;;  %v606_v49 = vadd.f32 %v2095_v5, %v605_v24  ;;  %v1361_v26 = vpop.f32.mrb[19].mxu1 }
 0x23e   :  { %v754_v27 = vmax.f32 %v606_v49, 0.0  ;;  %1466 = vmatprep.mubr.f32.mxu0 %v753_v25 }
 0x240   :  { %1467 = vmatmul.mubr.f32.vlgmr.msra.gmra.mrb[60].mxu0 %v754_v27 }
 0x241   :  { %v610_v13 = vpop.f32.mrb[20].mxu1 }
 0x242   :  { %v611_v28 = vadd.f32 %v2095_v5, %v610_v13  ;;  %v1364_v0 = vpop.f32.mrb[21].mxu1 }
 0x243   :  { %v613_v29 = vpop.f32.mrb[22].mxu1 }
 0x244   :  { %v755_v38 = vmax.f32 %v611_v28, 0.0  ;;  %v614_v30 = vadd.f32 %v2095_v5, %v613_v29  ;;  %v1365_v32 = vpop.f32.mrb[23].mxu1 }
 0x246   :  { %v756_v33 = vmax.f32 %v614_v30, 0.0  ;;  %1469 = vmatprep.mubr.f32.mxu0 %v755_v38 }
 0x248   :  { %1470 = vmatmul.mubr.f32.gmra.mrb[62].mxu0 %v756_v33 }
 0x249   :  { %v618_v34 = vpop.f32.mrb[24].mxu1 }
 0x24a   :  { %v619_v35 = vadd.f32 %v2095_v5, %v618_v34  ;;  %v1368_v36 = vpop.f32.mrb[25].mxu1 }
 0x24b   :  { %v621_v37 = vpop.f32.mrb[26].mxu1 }
 0x24c   :  { %v757_v39 = vmax.f32 %v619_v35, 0.0  ;;  %v622_v40 = vadd.f32 %v2095_v5, %v621_v37  ;;  %v1369_v41 = vpop.f32.mrb[27].mxu1 }
 0x24e   :  { %v758_v42 = vmax.f32 %v622_v40, 0.0  ;;  %1472 = vmatprep.mubr.f32.mxu0 %v757_v39 }
 0x250   :  { %1473 = vmatmul.mubr.f32.gmra.mrb[64].mxu0 %v758_v42 }
 0x251   :  { %v626_v43 = vpop.f32.mrb[28].mxu1 }
 0x252   :  { %v627_v44 = vadd.f32 %v2095_v5, %v626_v43  ;;  %v1372_v45 = vpop.f32.mrb[29].mxu1 }
 0x253   :  { %v629_v46 = vpop.f32.mrb[30].mxu1 }
 0x254   :  { %v759_v47 = vmax.f32 %v627_v44, 0.0  ;;  %v630_v48 = vadd.f32 %v2095_v5, %v629_v46  ;;  %v1373_v50 = vpop.f32.mrb[31].mxu1 }
 0x256   :  { %v760_v51 = vmax.f32 %v630_v48, 0.0  ;;  %1475 = vmatprep.mubr.f32.mxu0 %v759_v47 }
 0x258   :  { %1476 = vmatmul.mubr.f32.gmra.mrb[66].mxu0 %v760_v51 }
 0x259   :  { %v634_v52 = vpop.f32.mrb[32].mxu1 }
 0x25a   :  { %v635_v53 = vadd.f32 %v2095_v5, %v634_v52  ;;  %v1376_v54 = vpop.f32.mrb[33].mxu1 }
 0x25b   :  { %v637_v55 = vpop.f32.mrb[34].mxu1 }
 0x25c   :  { %v761_v56 = vmax.f32 %v635_v53, 0.0  ;;  %v638_v57 = vadd.f32 %v2095_v5, %v637_v55  ;;  %v1377_v58 = vpop.f32.mrb[35].mxu1 }
 0x25e   :  { %v762_v59 = vmax.f32 %v638_v57, 0.0  ;;  %1478 = vmatprep.mubr.f32.mxu0 %v761_v56 }
 0x260   :  { %1479 = vmatmul.mubr.f32.gmra.mrb[68].mxu0 %v762_v59 }
 0x261   :  { %v642_v60 = vpop.f32.mrb[36].mxu1 }
 0x262   :  { %v643_v61 = vadd.f32 %v2095_v5, %v642_v60  ;;  %v1380_v62 = vpop.f32.mrb[37].mxu1 }
 0x263   :  { %v645_v63 = vpop.f32.mrb[38].mxu1 }
 0x264   :  { %v763_v1 = vmax.f32 %v643_v61, 0.0  ;;  %v646_v2 = vadd.f32 %v2095_v5, %v645_v63  ;;  %v1381_v3 = vpop.f32.mrb[39].mxu1 }
 0x266   :  { %v764_v4 = vmax.f32 %v646_v2, 0.0  ;;  %1481 = vmatprep.mubr.f32.mxu0 %v763_v1 }
 0x268   :  { %1482 = vmatmul.mubr.f32.gmra.mrb[70].mxu0 %v764_v4 }
 0x269   :  { %v650_v6 = vpop.f32.mrb[40].mxu1 }
 0x26a   :  { %v651_v7 = vadd.f32 %v2095_v5, %v650_v6  ;;  %v1384_v8 = vpop.f32.mrb[41].mxu1 }
 0x26b   :  { %v653_v9 = vpop.f32.mrb[42].mxu1 }
 0x26c   :  { %v765_v10 = vmax.f32 %v651_v7, 0.0  ;;  %v654_v11 = vadd.f32 %v2095_v5, %v653_v9  ;;  %v1385_v12 = vpop.f32.mrb[43].mxu1 }
 0x26e   :  { %v766_v14 = vmax.f32 %v654_v11, 0.0  ;;  %1484 = vmatprep.mubr.f32.mxu0 %v765_v10 }
 0x270   :  { %1485 = vmatmul.mubr.f32.gmra.mrb[72].mxu0 %v766_v14 }
 0x271   :  { %v658_v15 = vpop.f32.mrb[44].mxu1 }
 0x272   :  { %v659_v16 = vadd.f32 %v2095_v5, %v658_v15  ;;  %v1388_v17 = vpop.f32.mrb[45].mxu1 }
 0x273   :  { %v661_v18 = vpop.f32.mrb[46].mxu1 }
 0x274   :  { %v767_v19 = vmax.f32 %v659_v16, 0.0  ;;  %v662_v20 = vadd.f32 %v2095_v5, %v661_v18  ;;  %v1389_v21 = vpop.f32.mrb[47].mxu1 }
 0x276   :  { %v768_v22 = vmax.f32 %v662_v20, 0.0  ;;  %1487 = vmatprep.mubr.f32.mxu0 %v767_v19 }
 0x278   :  { %1488 = vmatmul.mubr.f32.gmra.mrb[74].mxu0 %v768_v22 }
 0x279   :  { %v666_v31 = vpop.f32.mrb[48].mxu1 }
 0x27a   :  { %v667_v23 = vadd.f32 %v2095_v5, %v666_v31  ;;  %v1392_v24 = vpop.f32.mrb[49].mxu1 }
 0x27b   :  { %v669_v25 = vpop.f32.mrb[50].mxu1 }
 0x27c   :  { %v769_v49 = vmax.f32 %v667_v23, 0.0  ;;  %v670_v26 = vadd.f32 %v2095_v5, %v669_v25  ;;  %v1393_v27 = vpop.f32.mrb[51].mxu1 }
 0x27e   :  { %v770_v13 = vmax.f32 %v670_v26, 0.0  ;;  %1490 = vmatprep.mubr.f32.mxu0 %v769_v49 }
 0x280   :  { %1491 = vmatmul.mubr.f32.gmra.mrb[76].mxu0 %v770_v13 }
 0x281   :  { %v674_v28 = vpop.f32.mrb[52].mxu1 }
 0x282   :  { %v675_v0 = vadd.f32 %v2095_v5, %v674_v28  ;;  %v1396_v29 = vpop.f32.mrb[53].mxu1 }
 0x283   :  { %v677_v38 = vpop.f32.mrb[54].mxu1 }
 0x284   :  { %v771_v30 = vmax.f32 %v675_v0, 0.0  ;;  %v678_v32 = vadd.f32 %v2095_v5, %v677_v38  ;;  %v1397_v33 = vpop.f32.mrb[55].mxu1 }
 0x286   :  { %v772_v34 = vmax.f32 %v678_v32, 0.0  ;;  %1493 = vmatprep.mubr.f32.mxu0 %v771_v30 }
 0x288   :  { %1494 = vmatmul.mubr.f32.gmra.mrb[78].mxu0 %v772_v34 }
 0x289   :  { %v682_v35 = vpop.f32.mrb[56].mxu1 }
 0x28a   :  { %v683_v36 = vadd.f32 %v2095_v5, %v682_v35  ;;  %v1400_v37 = vpop.f32.mrb[57].mxu1 }
 0x28b   :  { %v685_v39 = vpop.f32.mrb[58].mxu1 }
 0x28c   :  { %v773_v40 = vmax.f32 %v683_v36, 0.0  ;;  %v686_v41 = vadd.f32 %v2095_v5, %v685_v39  ;;  %v1401_v42 = vpop.f32.mrb[59].mxu1 }
 0x28e   :  { %v774_v43 = vmax.f32 %v686_v41, 0.0  ;;  %1496 = vmatprep.mubr.f32.mxu0 %v773_v40 }
 0x290   :  { %1497 = vmatmul.mubr.f32.gmra.mrb[80].mxu0 %v774_v43 }
 0x291   :  { %v690_v44 = vpop.f32.mrb[60].mxu1 }
 0x292   :  { %v691_v45 = vadd.f32 %v2095_v5, %v690_v44  ;;  %v1404_v46 = vpop.f32.mrb[61].mxu1 }
 0x293   :  { %v693_v47 = vpop.f32.mrb[62].mxu1 }
 0x294   :  { %v775_v48 = vmax.f32 %v691_v45, 0.0  ;;  %v694_v50 = vadd.f32 %v2095_v5, %v693_v47  ;;  %v1405_v51 = vpop.f32.mrb[63].mxu1  ;;  %v2135_v45 = vld [vmem:[#allocation13] ss:$0 sm:$0xff] }
 0x296   :  { %v776_v52 = vmax.f32 %v694_v50, 0.0  ;;  %1499 = vmatprep.mubr.f32.mxu0 %v775_v48 }
 0x298   :  { %1500 = vmatmul.mubr.f32.gmra.mrb[82].mxu0 %v776_v52 }
 0x299   :  { %v698_v53 = vpop.f32.mrb[64].mxu1 }
 0x29a   :  { %v699_v54 = vadd.f32 %v2095_v5, %v698_v53  ;;  %v1408_v55 = vpop.f32.mrb[65].mxu1 }
 0x29b   :  { %v701_v56 = vpop.f32.mrb[66].mxu1 }
 0x29c   :  { %v777_v57 = vmax.f32 %v699_v54, 0.0  ;;  %v702_v58 = vadd.f32 %v2095_v5, %v701_v56  ;;  %v1409_v59 = vpop.f32.mrb[67].mxu1 }
 0x29e   :  { %v778_v60 = vmax.f32 %v702_v58, 0.0  ;;  %1502 = vmatprep.mubr.f32.mxu0 %v777_v57 }
 0x2a0   :  { %1503 = vmatmul.mubr.f32.gmra.mrb[84].mxu0 %v778_v60 }
 0x2a1   :  { %v706_v61 = vpop.f32.mrb[68].mxu1 }
 0x2a2   :  { %v707_v62 = vadd.f32 %v2095_v5, %v706_v61  ;;  %v1412_v63 = vpop.f32.mrb[69].mxu1 }
 0x2a3   :  { %v709_v1 = vpop.f32.mrb[70].mxu1 }
 0x2a4   :  { %v779_v2 = vmax.f32 %v707_v62, 0.0  ;;  %v710_v3 = vadd.f32 %v2095_v5, %v709_v1  ;;  %v1413_v4 = vpop.f32.mrb[71].mxu1 }
 0x2a6   :  { %v780_v6 = vmax.f32 %v710_v3, 0.0  ;;  %1505 = vmatprep.mubr.f32.mxu0 %v779_v2 }
 0x2a8   :  { %1506 = vmatmul.mubr.f32.gmra.mrb[86].mxu0 %v780_v6 }
 0x2a9   :  { %v714_v7 = vpop.f32.mrb[72].mxu1 }
 0x2aa   :  { %v715_v8 = vadd.f32 %v2095_v5, %v714_v7  ;;  %v1416_v9 = vpop.f32.mrb[73].mxu1 }
 0x2ab   :  { %v717_v10 = vpop.f32.mrb[74].mxu1 }
 0x2ac   :  { %v781_v11 = vmax.f32 %v715_v8, 0.0  ;;  %v718_v12 = vadd.f32 %v2095_v5, %v717_v10  ;;  %v1417_v14 = vpop.f32.mrb[75].mxu1 }
 0x2ae   :  { %v782_v15 = vmax.f32 %v718_v12, 0.0  ;;  %1508 = vmatprep.mubr.f32.mxu0 %v781_v11 }
 0x2b0   :  { %1509 = vmatmul.mubr.f32.gmra.mrb[88].mxu0 %v782_v15 }
 0x2b1   :  { %v722_v16 = vpop.f32.mrb[76].mxu1 }
 0x2b2   :  { %v723_v17 = vadd.f32 %v2095_v5, %v722_v16  ;;  %v1420_v18 = vpop.f32.mrb[77].mxu1 }
 0x2b3   :  { %v725_v19 = vpop.f32.mrb[78].mxu1 }
 0x2b4   :  { %v783_v20 = vmax.f32 %v723_v17, 0.0  ;;  %v726_v21 = vadd.f32 %v2095_v5, %v725_v19  ;;  %v1421_v22 = vpop.f32.mrb[79].mxu1 }
 0x2b6   :  { %v784_v31 = vmax.f32 %v726_v21, 0.0  ;;  %1511 = vmatprep.mubr.f32.mxu0 %v783_v20 }
 0x2b8   :  { %1512 = vmatmul.mubr.f32.gmra.mrb[90].mxu0 %v784_v31 }
 0x2b9   :  { %v730_v23 = vpop.f32.mrb[80].mxu1 }
 0x2ba   :  { %v731_v24 = vadd.f32 %v2095_v5, %v730_v23  ;;  %v1424_v25 = vpop.f32.mrb[81].mxu1 }
 0x2bb   :  { %v733_v49 = vpop.f32.mrb[82].mxu1 }
 0x2bc   :  { %v785_v26 = vmax.f32 %v731_v24, 0.0  ;;  %v734_v27 = vadd.f32 %v2095_v5, %v733_v49  ;;  %v1425_v13 = vpop.f32.mrb[83].mxu1 }
 0x2be   :  { %v786_v28 = vmax.f32 %v734_v27, 0.0  ;;  %1514 = vmatprep.mubr.f32.mxu0 %v785_v26 }
 0x2c0   :  { %1515 = vmatmul.mubr.f32.gmra.mrb[92].mxu0 %v786_v28 }
 0x2c1   :  { %v738_v0 = vpop.f32.mrb[84].mxu1 }
 0x2c2   :  { %v739_v29 = vadd.f32 %v2095_v5, %v738_v0  ;;  %v1428_v38 = vpop.f32.mrb[85].mxu1 }
 0x2c3   :  { %v741_v30 = vpop.f32.mrb[86].mxu1 }
 0x2c4   :  { %v787_v32 = vmax.f32 %v739_v29, 0.0  ;;  %v742_v33 = vadd.f32 %v2095_v5, %v741_v30  ;;  %v1429_v34 = vpop.f32.mrb[87].mxu1 }
 0x2c6   :  { %v788_v35 = vmax.f32 %v742_v33, 0.0  ;;  %1517 = vmatprep.mubr.f32.mxu0 %v787_v32 }
 0x2c8   :  { %1518 = vmatmul.mubr.f32.gmra.mrb[94].mxu0 %v788_v35 }
 0x2c9   :  { %v746_v36 = vpop.f32.mrb[88].mxu1 }
 0x2ca   :  { %v747_v37 = vadd.f32 %v2095_v5, %v746_v36  ;;  %v1432_v39 = vpop.f32.mrb[89].mxu1 }
 0x2cb   :  { %v749_v40 = vpop.f32.mrb[90].mxu1 }
 0x2cc   :  { %v789_v41 = vmax.f32 %v747_v37, 0.0  ;;  %v750_v42 = vadd.f32 %v2095_v5, %v749_v40  ;;  %v1433_v43 = vpop.f32.mrb[91].mxu1 }
 0x2ce   :  { %v790_v44 = vmax.f32 %v750_v42, 0.0  ;;  %1520 = vmatprep.mubr.f32.mxu1 %v789_v41 }
 0x2d0   :  { %1521 = vmatmul.mubr.f32.vlgmr.msra.gmra.mrb[92].mxu1 %v790_v44 }
 0x313   :  { %v1468_v46 = vpop.f32.mrb[60].mxu0 }
 0x314   :  { %v886_v47 = vadd.f32 %v1468_v46, %v2135_v45  ;;  %v880_v48 = vpop.f32.mrb[61].mxu0 }
 0x315   :  { %v881_v50 = vadd.f32 %v2135_v45, %v880_v48 }
 0x316   :  { %1071 = vst.msk [vmem:[#allocation14 + $0x8] sm:$0xff] %vm1069_vm2, %v886_v47 }
 0x317   :  { %1070 = vst.msk [vmem:[#allocation14] sm:$0xff] %vm1069_vm2, %v881_v50 }
 0x31b   :  { %v1471_v51 = vpop.f32.mrb[62].mxu0 }
 0x31c   :  { %v896_v5 = vadd.f32 %v1471_v51, %v2135_v45  ;;  %v890_v52 = vpop.f32.mrb[63].mxu0 }
 0x31d   :  { %v891_v53 = vadd.f32 %v2135_v45, %v890_v52 }
 0x31e   :  { %1073 = vst.msk [vmem:[#allocation14 + $0x18] sm:$0xff] %vm1069_vm2, %v896_v5 }
 0x31f   :  { %1072 = vst.msk [vmem:[#allocation14 + $0x10] sm:$0xff] %vm1069_vm2, %v891_v53 }
 0x323   :  { %v1474_v54 = vpop.f32.mrb[64].mxu0 }
 0x324   :  { %v906_v55 = vadd.f32 %v1474_v54, %v2135_v45  ;;  %v900_v56 = vpop.f32.mrb[65].mxu0 }
 0x325   :  { %v901_v57 = vadd.f32 %v2135_v45, %v900_v56 }
 0x326   :  { %1075 = vst.msk [vmem:[#allocation14 + $0x28] sm:$0xff] %vm1069_vm2, %v906_v55 }
 0x327   :  { %1074 = vst.msk [vmem:[#allocation14 + $0x20] sm:$0xff] %vm1069_vm2, %v901_v57 }
 0x32b   :  { %v1477_v58 = vpop.f32.mrb[66].mxu0 }
 0x32c   :  { %v916_v59 = vadd.f32 %v1477_v58, %v2135_v45  ;;  %v910_v60 = vpop.f32.mrb[67].mxu0 }
 0x32d   :  { %v911_v61 = vadd.f32 %v2135_v45, %v910_v60 }
 0x32e   :  { %1077 = vst.msk [vmem:[#allocation14 + $0x38] sm:$0xff] %vm1069_vm2, %v916_v59 }
 0x32f   :  { %1076 = vst.msk [vmem:[#allocation14 + $0x30] sm:$0xff] %vm1069_vm2, %v911_v61 }
 0x333   :  { %v1480_v62 = vpop.f32.mrb[68].mxu0 }
 0x334   :  { %v926_v63 = vadd.f32 %v1480_v62, %v2135_v45  ;;  %v920_v1 = vpop.f32.mrb[69].mxu0 }
 0x335   :  { %v921_v2 = vadd.f32 %v2135_v45, %v920_v1 }
 0x336   :  { %1079 = vst.msk [vmem:[#allocation14 + $0x48] sm:$0xff] %vm1069_vm2, %v926_v63 }
 0x337   :  { %1078 = vst.msk [vmem:[#allocation14 + $0x40] sm:$0xff] %vm1069_vm2, %v921_v2 }
 0x33b   :  { %v1483_v3 = vpop.f32.mrb[70].mxu0 }
 0x33c   :  { %v936_v4 = vadd.f32 %v1483_v3, %v2135_v45  ;;  %v930_v6 = vpop.f32.mrb[71].mxu0 }
 0x33d   :  { %v931_v7 = vadd.f32 %v2135_v45, %v930_v6 }
 0x33e   :  { %1081 = vst.msk [vmem:[#allocation14 + $0x58] sm:$0xff] %vm1069_vm2, %v936_v4 }
 0x33f   :  { %1080 = vst.msk [vmem:[#allocation14 + $0x50] sm:$0xff] %vm1069_vm2, %v931_v7 }
 0x343   :  { %v1486_v8 = vpop.f32.mrb[72].mxu0 }
 0x344   :  { %v946_v9 = vadd.f32 %v1486_v8, %v2135_v45  ;;  %v940_v10 = vpop.f32.mrb[73].mxu0 }
 0x345   :  { %v941_v11 = vadd.f32 %v2135_v45, %v940_v10 }
 0x346   :  { %1083 = vst.msk [vmem:[#allocation14 + $0x68] sm:$0xff] %vm1069_vm2, %v946_v9 }
 0x347   :  { %1082 = vst.msk [vmem:[#allocation14 + $0x60] sm:$0xff] %vm1069_vm2, %v941_v11 }
 0x34b   :  { %v1489_v12 = vpop.f32.mrb[74].mxu0 }
 0x34c   :  { %v956_v14 = vadd.f32 %v1489_v12, %v2135_v45  ;;  %v950_v15 = vpop.f32.mrb[75].mxu0 }
 0x34d   :  { %v951_v16 = vadd.f32 %v2135_v45, %v950_v15 }
 0x34e   :  { %1085 = vst.msk [vmem:[#allocation14 + $0x78] sm:$0xff] %vm1069_vm2, %v956_v14 }
 0x34f   :  { %1084 = vst.msk [vmem:[#allocation14 + $0x70] sm:$0xff] %vm1069_vm2, %v951_v16 }
 0x353   :  { %v1492_v17 = vpop.f32.mrb[76].mxu0 }
 0x354   :  { %v966_v18 = vadd.f32 %v1492_v17, %v2135_v45  ;;  %v960_v19 = vpop.f32.mrb[77].mxu0 }
 0x355   :  { %v961_v20 = vadd.f32 %v2135_v45, %v960_v19 }
 0x356   :  { %1087 = vst.msk [vmem:[#allocation14 + $0x88] sm:$0xff] %vm1069_vm2, %v966_v18 }
 0x357   :  { %1086 = vst.msk [vmem:[#allocation14 + $0x80] sm:$0xff] %vm1069_vm2, %v961_v20 }
 0x35b   :  { %v1495_v21 = vpop.f32.mrb[78].mxu0 }
 0x35c   :  { %v976_v22 = vadd.f32 %v1495_v21, %v2135_v45  ;;  %v970_v31 = vpop.f32.mrb[79].mxu0 }
 0x35d   :  { %v971_v23 = vadd.f32 %v2135_v45, %v970_v31 }
 0x35e   :  { %1089 = vst.msk [vmem:[#allocation14 + $0x98] sm:$0xff] %vm1069_vm2, %v976_v22 }
 0x35f   :  { %1088 = vst.msk [vmem:[#allocation14 + $0x90] sm:$0xff] %vm1069_vm2, %v971_v23 }
 0x363   :  { %v1498_v24 = vpop.f32.mrb[80].mxu0 }
 0x364   :  { %v986_v25 = vadd.f32 %v1498_v24, %v2135_v45  ;;  %v980_v49 = vpop.f32.mrb[81].mxu0 }
 0x365   :  { %v981_v26 = vadd.f32 %v2135_v45, %v980_v49 }
 0x366   :  { %1091 = vst.msk [vmem:[#allocation14 + $0xa8] sm:$0xff] %vm1069_vm2, %v986_v25 }
 0x367   :  { %1090 = vst.msk [vmem:[#allocation14 + $0xa0] sm:$0xff] %vm1069_vm2, %v981_v26 }
 0x36b   :  { %v1501_v27 = vpop.f32.mrb[82].mxu0 }
 0x36c   :  { %v996_v13 = vadd.f32 %v1501_v27, %v2135_v45  ;;  %v990_v28 = vpop.f32.mrb[83].mxu0 }
 0x36d   :  { %v991_v0 = vadd.f32 %v2135_v45, %v990_v28 }
 0x36e   :  { %1093 = vst.msk [vmem:[#allocation14 + $0xb8] sm:$0xff] %vm1069_vm2, %v996_v13 }
 0x36f   :  { %1092 = vst.msk [vmem:[#allocation14 + $0xb0] sm:$0xff] %vm1069_vm2, %v991_v0 }
 0x373   :  { %v1504_v29 = vpop.f32.mrb[84].mxu0 }
 0x374   :  { %v1006_v38 = vadd.f32 %v1504_v29, %v2135_v45  ;;  %v1000_v30 = vpop.f32.mrb[85].mxu0 }
 0x375   :  { %v1001_v32 = vadd.f32 %v2135_v45, %v1000_v30 }
 0x376   :  { %1095 = vst.msk [vmem:[#allocation14 + $0xc8] sm:$0xff] %vm1069_vm2, %v1006_v38 }
 0x377   :  { %1094 = vst.msk [vmem:[#allocation14 + $0xc0] sm:$0xff] %vm1069_vm2, %v1001_v32 }
 0x37b   :  { %v1507_v33 = vpop.f32.mrb[86].mxu0 }
 0x37c   :  { %v1016_v34 = vadd.f32 %v1507_v33, %v2135_v45  ;;  %v1010_v35 = vpop.f32.mrb[87].mxu0 }
 0x37d   :  { %v1011_v36 = vadd.f32 %v2135_v45, %v1010_v35 }
 0x37e   :  { %1097 = vst.msk [vmem:[#allocation14 + $0xd8] sm:$0xff] %vm1069_vm2, %v1016_v34 }
 0x37f   :  { %1096 = vst.msk [vmem:[#allocation14 + $0xd0] sm:$0xff] %vm1069_vm2, %v1011_v36 }
 0x383   :  { %v1510_v37 = vpop.f32.mrb[88].mxu0 }
 0x384   :  { %v1026_v39 = vadd.f32 %v1510_v37, %v2135_v45  ;;  %v1020_v40 = vpop.f32.mrb[89].mxu0 }
 0x385   :  { %v1021_v41 = vadd.f32 %v2135_v45, %v1020_v40 }
 0x386   :  { %1099 = vst.msk [vmem:[#allocation14 + $0xe8] sm:$0xff] %vm1069_vm2, %v1026_v39 }
 0x387   :  { %1098 = vst.msk [vmem:[#allocation14 + $0xe0] sm:$0xff] %vm1069_vm2, %v1021_v41 }
 0x38b   :  { %v1513_v42 = vpop.f32.mrb[90].mxu0 }
 0x38c   :  { %v1036_v43 = vadd.f32 %v1513_v42, %v2135_v45  ;;  %v1030_v44 = vpop.f32.mrb[91].mxu0 }
 0x38d   :  { %v1031_v46 = vadd.f32 %v2135_v45, %v1030_v44 }
 0x38e   :  { %1101 = vst.msk [vmem:[#allocation14 + $0xf8] sm:$0xff] %vm1069_vm2, %v1036_v43 }
 0x38f   :  { %1100 = vst.msk [vmem:[#allocation14 + $0xf0] sm:$0xff] %vm1069_vm2, %v1031_v46 }
 0x393   :  { %v1516_v47 = vpop.f32.mrb[92].mxu0 }
 0x394   :  { %v1046_v48 = vadd.f32 %v1516_v47, %v2135_v45  ;;  %v1040_v50 = vpop.f32.mrb[93].mxu0 }
 0x395   :  { %v1041_v51 = vadd.f32 %v2135_v45, %v1040_v50 }
 0x396   :  { %1103 = vst.msk [vmem:[#allocation14 + $0x108] sm:$0xff] %vm1069_vm2, %v1046_v48 }
 0x397   :  { %1102 = vst.msk [vmem:[#allocation14 + $0x100] sm:$0xff] %vm1069_vm2, %v1041_v51 }
 0x39b   :  { %v1519_v5 = vpop.f32.mrb[94].mxu0 }
 0x39c   :  { %v1056_v52 = vadd.f32 %v1519_v5, %v2135_v45  ;;  %v1050_v53 = vpop.f32.mrb[95].mxu0 }
 0x39d   :  { %v1051_v54 = vadd.f32 %v2135_v45, %v1050_v53 }
 0x39e   :  { %1105 = vst.msk [vmem:[#allocation14 + $0x118] sm:$0xff] %vm1069_vm2, %v1056_v52 }
 0x39f   :  { %1104 = vst.msk [vmem:[#allocation14 + $0x110] sm:$0xff] %vm1069_vm2, %v1051_v54 }
 0x3a3   :  { %v1522_v55 = vpop.f32.mrb[92].mxu1 }
 0x3a4   :  { %v1066_v56 = vadd.f32 %v1522_v55, %v2135_v45  ;;  %v1060_v57 = vpop.f32.mrb[93].mxu1 }
 0x3a5   :  { %v1061_v58 = vadd.f32 %v2135_v45, %v1060_v57 }
 0x3a6   :  { %1107 = vst.msk [vmem:[#allocation14 + $0x128] sm:$0xff] %vm1069_vm2, %v1066_v56 }
 0x3a7   :  { %1106 = vst.msk [vmem:[#allocation14 + $0x120] sm:$0xff] %vm1069_vm2, %v1061_v58 }
 0x3a8   :  { %1764 = shalt.err (!%p1761_p4)
}
 0x3a9   :  { %s1765_s19 = scalar_lea.hbm %s2235_s7, 4864 }
 0x3aa   :  { %p1766_p5 = scmp.ne.s32.totalorder %s2235_s7, %s1765_s19  ;;  %p1769_p6 = scmp.lt.u32.totalorder %s1765_s19, %s2235_s7 }
 0x3ac   :  { %p1771_p7 = pnand %p1769_p6, %p1766_p5 }
 0x3ae   :  { %1774 = shalt.err (!%p1771_p7)
}
 0x3af   :  { %1119 = dma.vmem_to_hbm [thread:$0]  %s1114_s29, 4864, %s2235_s7, [#allocation4], %s1791_s11, %s1791_s11, %s1792_s12  }
 0x3b0   :  { %1783 = dma.done.wait [#allocation4], 4864  }
 0x3b1   :  { %1784 = vsyncadd [#allocation4], 4294962432 }
 0x3b2   :  { %1123 = vsyncpa [#allocation3], 1 }
 0x3b3   :  { %1124 = vsyncpa [#allocation6], 1 }
 0x3b4   :  { %1125 = vsyncpa [#allocation9], 1 }
 0x3b5   :  { %1126 = vsyncpa [#allocation12], 1 }
 0x3b6   :  { %1127 = vsyncpa [#allocation4], 1 }

</bundles_post_ra>
